<compile_context>
chip_gen: v6e
topology: v6e:2x2x1
jax: 0.10.0
libtpu: 0.0.40
codegen_flags: <defaults>
</compile_context>

<pallas_src>
import functools

import jax
import jax.numpy as jnp
from jax.experimental import pallas as pl
from jax.experimental.pallas import tpu as pltpu

CLAMP = 2.0          # GLOWCouplingBlock(clamp=2.0)
ATAN_SCALE = 0.636   # FrEIA "ATAN" clamp activation: s = clamp * 0.636 * atan(s_raw)


def _round_up(n, m):
    return ((n + m - 1) // m) * m


def _atan_f32(x):
    """float32 atan (Cephes-style range reduction + minimax poly).

    Built only from VPU/EUP-friendly ops (+,-,*,abs,where, EUP reciprocal with
    one Newton refinement).  Matches jnp.arctan / torch.atan to ~1e-6 in f32.
    """
    sign = jnp.where(x < 0.0, -1.0, 1.0)
    ax = jnp.abs(x)
    t3p8 = 2.414213562373095   # tan(3*pi/8)
    tp8 = 0.4142135623730951   # tan(pi/8)
    big = ax > t3p8
    mid = jnp.logical_and(ax <= t3p8, ax > tp8)

    def recip(v):
        # EUP approximate reciprocal (free-ish slot) + one Newton step -> f32
        r = pl.reciprocal(v, approx=True)
        return r * (2.0 - v * r)

    inv_ax = recip(jnp.maximum(ax, 1e-30))
    inv_ap1 = recip(ax + 1.0)
    xr = jnp.where(big, -inv_ax,
                   jnp.where(mid, (ax - 1.0) * inv_ap1, ax))
    y0 = jnp.where(big, jnp.float32(jnp.pi / 2.0),
                   jnp.where(mid, jnp.float32(jnp.pi / 4.0), jnp.float32(0.0)))
    z = xr * xr
    poly = ((((8.05374449538e-2 * z - 1.38776856032e-1) * z
              + 1.99777106478e-1) * z - 3.33329491539e-1) * z) * xr + xr
    return sign * (y0 + poly)


def _cinn_kernel(x_ref,
                 s2_w1, s2_b1, s2_w2, s2_b2, s2_w3, s2_b3,
                 s1_w1, s1_b1, s1_w2, s1_b2, s1_w3, s1_b3,
                 perm,
                 z_out, lj_out,
                 z_carry, lj_carry,
                 *, d_pad):
    f32 = jnp.float32
    l = pl.program_id(1)   # layer axis (inner, "arbitrary"); weights stream per layer

    @pl.when(l == 0)
    def _():
        z_carry[...] = x_ref[...]
        lj_carry[...] = jnp.zeros_like(lj_carry)

    z = z_carry[...]                 # (tb, 2*d_pad), x1 in [:, :d_pad], x2 in [:, d_pad:]
    x1 = z[:, :d_pad]
    x2 = z[:, d_pad:]

    def mlp(u, w1, b1, w2, b2, w3, b3):
        # subnet_fc: Linear -> ReLU -> Linear -> ReLU -> Linear (s|t fused head)
        wd = w1.dtype
        h = jnp.dot(u.astype(wd), w1[...], preferred_element_type=f32) + b1[...]
        h = jnp.maximum(h, 0.0)
        h = jnp.dot(h.astype(wd), w2[...], preferred_element_type=f32) + b2[...]
        h = jnp.maximum(h, 0.0)
        return jnp.dot(h.astype(wd), w3[...], preferred_element_type=f32) + b3[...]

    # GLOW coupling, first half: transform x1 with subnet2(x2)
    a2 = mlp(x2, s2_w1, s2_b1, s2_w2, s2_b2, s2_w3, s2_b3)      # (tb, 2*d_pad)
    s2 = CLAMP * ATAN_SCALE * _atan_f32(a2[:, :d_pad])
    y1 = jnp.exp(s2) * x1 + a2[:, d_pad:]

    # second half: transform x2 with subnet1(y1)
    a1 = mlp(y1, s1_w1, s1_b1, s1_w2, s1_b2, s1_w3, s1_b3)
    s1 = CLAMP * ATAN_SCALE * _atan_f32(a1[:, :d_pad])
    y2 = jnp.exp(s1) * x2 + a1[:, d_pad:]

    lj_carry[...] += s2 + s1         # padded columns contribute exact zeros

    # PermuteRandom (log-det 0): concat(y1, y2) @ P realized as a K-split pair
    # of full-width matmuls (no in-kernel concat, N = 2*d_pad lane dense).
    P = perm[...]
    wd = P.dtype
    z_carry[...] = (jnp.dot(y1.astype(wd), P[:d_pad, :], preferred_element_type=f32)
                    + jnp.dot(y2.astype(wd), P[d_pad:, :], preferred_element_type=f32))

    @pl.when(l == pl.num_programs(1) - 1)
    def _():
        z_out[...] = z_carry[...]
        red = jnp.sum(lj_carry[...], axis=-1, keepdims=True)     # (tb, 1)
        lj_out[...] = jnp.broadcast_to(red, lj_out.shape)         # lane-dense 128-wide


def cinn_forward(params, x, c, *, input_dim, hidden_dim, num_layers,
                 tile_b=1024, weight_dtype=jnp.float32):
    """Equivalent of CINN.forward(x, c, rev=False): returns (z, log_jac_det)."""
    B = x.shape[0]
    d1 = input_dim // 2
    d2 = input_dim - d1
    assert d1 == d2, "even input_dim required"
    L = num_layers
    assert L >= 1

    # Condition encoder (Linear -> ReLU -> Linear), plain XLA: the FrEIA blocks
    # were appended without cond=..., so the INN never consumes c_encoded and it
    # has no effect on (z, log_jac_det).
    h = jnp.maximum(jnp.dot(c, params["ce_w1"]) + params["ce_b1"], 0.0)
    _c_encoded = jnp.dot(h, params["ce_w2"]) + params["ce_b2"]  # faithful but unused

    # ---- lane-dense padding of d and hidden to multiples of 128 --------------
    d_pad = _round_up(d1, 128)
    h_pad = _round_up(hidden_dim, 128)
    wd = weight_dtype

    def pad_w(a, r, c_):   # (L, r0, c0) stack -> (L, r, c_) zero-padded
        return jnp.pad(a, ((0, 0), (0, r - a.shape[1]),
                           (0, c_ - a.shape[2]))).astype(wd)

    def pad_head(w3, b3, din):
        # (L, h, 2*din) fused head -> (L, h_pad, 2*d_pad): s-part in [..., :d_pad],
        # t-part in [..., d_pad:], so in-kernel s/t slices are 128-aligned.
        ws, wt = w3[:, :, :din], w3[:, :, din:]
        bs, bt = b3[:, :, :din], b3[:, :, din:]
        w = jnp.concatenate([pad_w(ws, h_pad, d_pad), pad_w(wt, h_pad, d_pad)], axis=-1)
        b = jnp.concatenate([pad_w(bs, 1, d_pad), pad_w(bt, 1, d_pad)], axis=-1)
        return w, b

    s2_w3, s2_b3 = pad_head(params["s2_w3"], params["s2_b3"], d1)
    s1_w3, s1_b3 = pad_head(params["s1_w3"], params["s1_b3"], d2)

    pm = params["perm"]
    pm_pad = jnp.zeros((L, 2 * d_pad, 2 * d_pad), jnp.float32)
    pm_pad = pm_pad.at[:, :d1, :d1].set(pm[:, :d1, :d1])
    pm_pad = pm_pad.at[:, :d1, d_pad:d_pad + d2].set(pm[:, :d1, d1:])
    pm_pad = pm_pad.at[:, d_pad:d_pad + d2, :d1].set(pm[:, d1:, :d1])
    pm_pad = pm_pad.at[:, d_pad:d_pad + d2, d_pad:d_pad + d2].set(pm[:, d1:, d1:])
    pm_pad = pm_pad.astype(wd)

    weights = [
        pad_w(params["s2_w1"], d_pad, h_pad), pad_w(params["s2_b1"], 1, h_pad),
        pad_w(params["s2_w2"], h_pad, h_pad), pad_w(params["s2_b2"], 1, h_pad),
        s2_w3, s2_b3,
        pad_w(params["s1_w1"], d_pad, h_pad), pad_w(params["s1_b1"], 1, h_pad),
        pad_w(params["s1_w2"], h_pad, h_pad), pad_w(params["s1_b2"], 1, h_pad),
        s1_w3, s1_b3,
        pm_pad,
    ]

    # ---- batch tiling: >= 2 tiles when possible (v7x: 2 TensorCores) ---------
    half = -(-B // 2)
    tb = min(tile_b, max(8, _round_up(half, 8)))
    B_pad = _round_up(B, tb)

    if d_pad == d1:
        x_in = x.astype(jnp.float32)
        if B_pad != B:
            x_in = jnp.pad(x_in, ((0, B_pad - B), (0, 0)))
    else:
        x_in = jnp.zeros((B_pad, 2 * d_pad), jnp.float32)
        x_in = x_in.at[:B, :d1].set(x[:, :d1])
        x_in = x_in.at[:B, d_pad:d_pad + d2].set(x[:, d1:])

    # ---- explicit VMEM budget (double-buffered per-layer weight slabs + tiles)
    per_layer_bytes = sum((w.size // w.shape[0]) * w.dtype.itemsize for w in weights)
    io_bytes = (2 * (tb * 2 * d_pad * 4) * 2      # x in + z out, double-buffered
                + 2 * (tb * 128 * 4)              # lj out
                + tb * 2 * d_pad * 4              # z carry scratch
                + tb * d_pad * 4)                 # lj carry scratch
    vmem_limit = int(min(max(2 * (2 * per_layer_bytes + io_bytes), 32 << 20), 64 << 20))

    def layer_spec(a):
        nz = a.ndim - 1
        return pl.BlockSpec((None,) + a.shape[1:],
                            lambda i, l, _n=nz: (l,) + (0,) * _n)

    batch2d = pl.BlockSpec((tb, 2 * d_pad), lambda i, l: (i, 0))

    kernel = functools.partial(_cinn_kernel, d_pad=d_pad)
    z_pad, lj = pl.pallas_call(
        kernel,
        grid=(B_pad // tb, L),
        in_specs=[batch2d] + [layer_spec(w) for w in weights],
        out_specs=(batch2d, pl.BlockSpec((tb, 128), lambda i, l: (i, 0))),
        out_shape=(
            jax.ShapeDtypeStruct((B_pad, 2 * d_pad), jnp.float32),
            jax.ShapeDtypeStruct((B_pad, 128), jnp.float32),
        ),
        scratch_shapes=[
            pltpu.VMEM((tb, 2 * d_pad), jnp.float32),   # z carry across layers
            pltpu.VMEM((tb, d_pad), jnp.float32),       # elementwise log-jac carry
        ],
        compiler_params=pltpu.CompilerParams(
            dimension_semantics=("parallel", "arbitrary"),
            vmem_limit_bytes=vmem_limit),
    )(x_in, *weights)

    if d_pad == d1:
        z = z_pad[:B]
    else:
        z = jnp.concatenate([z_pad[:B, :d1], z_pad[:B, d_pad:d_pad + d2]], axis=1)
    logjac = lj[:B, 0]
    # SequenceINN returns (z, log_jac_det) with log_jac_det of shape (B,)
    return z, logjac


def init_params(key, input_dim, condition_dim, hidden_dim, num_layers):
    d1 = input_dim // 2
    d2 = input_dim - d1
    assert d1 == d2, "even input_dim required so per-layer weights can be stacked"

    cnt = [0]

    def nk():
        cnt[0] += 1
        return jax.random.fold_in(key, cnt[0])

    def w(fan_in, fan_out):
        return (0.1 * jax.random.normal(nk(), (fan_in, fan_out))).astype(jnp.float32)

    def b(fan_out):
        return (0.05 * jax.random.normal(nk(), (1, fan_out))).astype(jnp.float32)

    def stack(fn):
        return jnp.stack([fn() for _ in range(num_layers)], axis=0)

    p = {
        "ce_w1": w(condition_dim, hidden_dim), "ce_b1": b(hidden_dim),
        "ce_w2": w(hidden_dim, hidden_dim),    "ce_b2": b(hidden_dim),
        # subnet1: split_len1 -> 2*split_len2 ; subnet2: split_len2 -> 2*split_len1
        "s1_w1": stack(lambda: w(d1, hidden_dim)),
        "s1_b1": stack(lambda: b(hidden_dim)),
        "s1_w2": stack(lambda: w(hidden_dim, hidden_dim)),
        "s1_b2": stack(lambda: b(hidden_dim)),
        "s1_w3": stack(lambda: w(hidden_dim, 2 * d2)),
        "s1_b3": stack(lambda: b(2 * d2)),
        "s2_w1": stack(lambda: w(d2, hidden_dim)),
        "s2_b1": stack(lambda: b(hidden_dim)),
        "s2_w2": stack(lambda: w(hidden_dim, hidden_dim)),
        "s2_b2": stack(lambda: b(hidden_dim)),
        "s2_w3": stack(lambda: w(hidden_dim, 2 * d1)),
        "s2_b3": stack(lambda: b(2 * d1)),
    }
    # Fixed (deterministic) random permutations as matrices so z @ PM == z[:, perm].
    perms = []
    for _ in range(num_layers):
        perm = jax.random.permutation(nk(), input_dim)
        perms.append(jnp.eye(input_dim, dtype=jnp.float32)[:, perm])
    p["perm"] = jnp.stack(perms, axis=0)
    return p


def _ref_forward(params, x, c, *, input_dim, num_layers):
    """Pure-JAX reference of the same forward semantics (uses jnp.arctan)."""
    d1 = input_dim // 2
    d2 = input_dim - d1

    def mlp3(u, w1, b1, w2, b2, w3, b3):
        h = jnp.maximum(u @ w1 + b1, 0.0)
        h = jnp.maximum(h @ w2 + b2, 0.0)
        return h @ w3 + b3

    z = x
    logjac = jnp.zeros((x.shape[0],), jnp.float32)
    for l in range(num_layers):
        x1, x2 = z[:, :d1], z[:, d1:]
        a2 = mlp3(x2, params["s2_w1"][l], params["s2_b1"][l], params["s2_w2"][l],
                  params["s2_b2"][l], params["s2_w3"][l], params["s2_b3"][l])
        s2 = CLAMP * ATAN_SCALE * jnp.arctan(a2[:, :d1]); t2 = a2[:, d1:]
        y1 = jnp.exp(s2) * x1 + t2
        a1 = mlp3(y1, params["s1_w1"][l], params["s1_b1"][l], params["s1_w2"][l],
                  params["s1_b2"][l], params["s1_w3"][l], params["s1_b3"][l])
        s1 = CLAMP * ATAN_SCALE * jnp.arctan(a1[:, :d2]); t1 = a1[:, d2:]
        y2 = jnp.exp(s1) * x2 + t1
        logjac = logjac + s2.sum(1) + s1.sum(1)
        z = jnp.concatenate([y1, y2], axis=1) @ params["perm"][l]
    return z, logjac


if __name__ == "__main__":
    B, INPUT_DIM, COND_DIM, HIDDEN_DIM, NUM_LAYERS = 12, 8, 6, 32, 3

    key = jax.random.PRNGKey(0)
    kx, kc, kp = jax.random.split(key, 3)
    x = jax.random.normal(kx, (B, INPUT_DIM), dtype=jnp.float32)
    c = jax.random.normal(kc, (B, COND_DIM), dtype=jnp.float32)
    params = init_params(kp, INPUT_DIM, COND_DIM, HIDDEN_DIM, NUM_LAYERS)

    z, logjac = cinn_forward(params, x, c, input_dim=INPUT_DIM,
                             hidden_dim=HIDDEN_DIM, num_layers=NUM_LAYERS)
    jax.block_until_ready((z, logjac))

    z_ref, lj_ref = _ref_forward(params, x, c, input_dim=INPUT_DIM,
                                 num_layers=NUM_LAYERS)
    assert z.shape == (B, INPUT_DIM) and logjac.shape == (B,)
    assert jnp.allclose(z, z_ref, atol=1e-3, rtol=1e-3)
    assert jnp.allclose(logjac, lj_ref, atol=1e-3, rtol=1e-3)

    print("KERNEL_OK")
</pallas_src>

<mosaic_0001>
module attributes {stable_mosaic.version = 11 : i64} {
  func.func @_cinn_kernel(%arg0: i32, %arg1: i32, %arg2: memref<8x256xf32, #tpu.memory_space<vmem>>, %arg3: memref<1x128x128xf32, #tpu.memory_space<vmem>>, %arg4: memref<1x1x128xf32, #tpu.memory_space<vmem>>, %arg5: memref<1x128x128xf32, #tpu.memory_space<vmem>>, %arg6: memref<1x1x128xf32, #tpu.memory_space<vmem>>, %arg7: memref<1x128x256xf32, #tpu.memory_space<vmem>>, %arg8: memref<1x1x256xf32, #tpu.memory_space<vmem>>, %arg9: memref<1x128x128xf32, #tpu.memory_space<vmem>>, %arg10: memref<1x1x128xf32, #tpu.memory_space<vmem>>, %arg11: memref<1x128x128xf32, #tpu.memory_space<vmem>>, %arg12: memref<1x1x128xf32, #tpu.memory_space<vmem>>, %arg13: memref<1x128x256xf32, #tpu.memory_space<vmem>>, %arg14: memref<1x1x256xf32, #tpu.memory_space<vmem>>, %arg15: memref<1x256x256xf32, #tpu.memory_space<vmem>>, %arg16: memref<8x256xf32, #tpu.memory_space<vmem>>, %arg17: memref<8x128xf32, #tpu.memory_space<vmem>>, %arg18: memref<8x256xf32, #tpu.memory_space<vmem>>, %arg19: memref<8x128xf32, #tpu.memory_space<vmem>>) attributes {dimension_semantics = [#tpu.dimension_semantics<parallel>, #tpu.dimension_semantics<arbitrary>], iteration_bounds = array<i64: 2, 3>, scalar_prefetch = 0 : i64, scratch_operands = 2 : i64, tpu.core_type = #tpu.core_type<tc>, window_params = [{transform_indices = @transform_0, window_bounds = array<i64: 8, 256>}, {transform_indices = @transform_1, window_bounds = array<i64: 1, 128, 128>}, {transform_indices = @transform_2, window_bounds = array<i64: 1, 1, 128>}, {transform_indices = @transform_3, window_bounds = array<i64: 1, 128, 128>}, {transform_indices = @transform_4, window_bounds = array<i64: 1, 1, 128>}, {transform_indices = @transform_5, window_bounds = array<i64: 1, 128, 256>}, {transform_indices = @transform_6, window_bounds = array<i64: 1, 1, 256>}, {transform_indices = @transform_7, window_bounds = array<i64: 1, 128, 128>}, {transform_indices = @transform_8, window_bounds = array<i64: 1, 1, 128>}, {transform_indices = @transform_9, window_bounds = array<i64: 1, 128, 128>}, {transform_indices = @transform_10, window_bounds = array<i64: 1, 1, 128>}, {transform_indices = @transform_11, window_bounds = array<i64: 1, 128, 256>}, {transform_indices = @transform_12, window_bounds = array<i64: 1, 1, 256>}, {transform_indices = @transform_13, window_bounds = array<i64: 1, 256, 256>}, {transform_indices = @transform_14, window_bounds = array<i64: 8, 256>}, {transform_indices = @transform_15, window_bounds = array<i64: 8, 128>}]} {
    %c0_i32 = arith.constant 0 : i32
    %0 = arith.cmpi eq, %arg1, %c0_i32 : i32
    %1 = arith.extui %0 : i1 to i32
    %c0_i32_0 = arith.constant 0 : i32
    %2 = arith.cmpi ne, %1, %c0_i32_0 : i32
    scf.if %2 {
      %c0_99 = arith.constant 0 : index
      %c0_100 = arith.constant 0 : index
      %195 = vector.load %arg2[%c0_99, %c0_100] : memref<8x256xf32, #tpu.memory_space<vmem>>, vector<8x256xf32>
      %c0_101 = arith.constant 0 : index
      %c0_102 = arith.constant 0 : index
      %196 = vector.load %arg18[%c0_101, %c0_102] : memref<8x256xf32, #tpu.memory_space<vmem>>, vector<8x256xf32>
      tpu.vector_store %arg18[%c0_101, %c0_102], %195 {strides = array<i32>} : memref<8x256xf32, #tpu.memory_space<vmem>>, vector<8x256xf32>,
      %cst_103 = arith.constant 0.000000e+00 : f32
      %197 = vector.broadcast %cst_103 : f32 to vector<8x128xf32>
      %c0_104 = arith.constant 0 : index
      %c0_105 = arith.constant 0 : index
      %198 = vector.load %arg19[%c0_104, %c0_105] : memref<8x128xf32, #tpu.memory_space<vmem>>, vector<8x128xf32>
      tpu.vector_store %arg19[%c0_104, %c0_105], %197 {strides = array<i32>} : memref<8x128xf32, #tpu.memory_space<vmem>>, vector<8x128xf32>,
    } else {
    }
    %c0 = arith.constant 0 : index
    %c0_1 = arith.constant 0 : index
    %3 = vector.load %arg18[%c0, %c0_1] : memref<8x256xf32, #tpu.memory_space<vmem>>, vector<8x256xf32>
    %4 = vector.extract_strided_slice %3 {offsets = [0, 0], sizes = [8, 128], strides = [1, 1]} : vector<8x256xf32> to vector<8x128xf32>
    %5 = vector.extract_strided_slice %3 {offsets = [0, 128], sizes = [8, 128], strides = [1, 1]} : vector<8x256xf32> to vector<8x128xf32>
    %c0_2 = arith.constant 0 : index
    %c0_3 = arith.constant 0 : index
    %c0_4 = arith.constant 0 : index
    %6 = vector.load %arg3[%c0_2, %c0_3, %c0_4] : memref<1x128x128xf32, #tpu.memory_space<vmem>>, vector<1x128x128xf32>
    %7 = vector.shape_cast %6 : vector<1x128x128xf32> to vector<128x128xf32>
    %cst = arith.constant dense<0.000000e+00> : vector<8x128xf32>
    %8 = tpu.matmul %5, %7, %cst {dimension_numbers = #tpu.dot_dimension_numbers<[1], [0], [0], [1], [0, 0, 1, 1], [], []>} : vector<8x128xf32>, vector<128x128xf32>, vector<8x128xf32> -> vector<8x128xf32>
    %c0_5 = arith.constant 0 : index
    %c0_6 = arith.constant 0 : index
    %c0_7 = arith.constant 0 : index
    %9 = vector.load %arg4[%c0_5, %c0_6, %c0_7] : memref<1x1x128xf32, #tpu.memory_space<vmem>>, vector<1x1x128xf32>
    %10 = vector.shape_cast %9 : vector<1x1x128xf32> to vector<1x128xf32>
    %11 = vector.broadcast %10 : vector<1x128xf32> to vector<8x128xf32>
    %12 = arith.addf %8, %11 : vector<8x128xf32>
    %cst_8 = arith.constant 0.000000e+00 : f32
    %13 = vector.broadcast %cst_8 : f32 to vector<8x128xf32>
    %14 = arith.maximumf %12, %13 : vector<8x128xf32>
    %c0_9 = arith.constant 0 : index
    %c0_10 = arith.constant 0 : index
    %c0_11 = arith.constant 0 : index
    %15 = vector.load %arg5[%c0_9, %c0_10, %c0_11] : memref<1x128x128xf32, #tpu.memory_space<vmem>>, vector<1x128x128xf32>
    %16 = vector.shape_cast %15 : vector<1x128x128xf32> to vector<128x128xf32>
    %cst_12 = arith.constant dense<0.000000e+00> : vector<8x128xf32>
    %17 = tpu.matmul %14, %16, %cst_12 {dimension_numbers = #tpu.dot_dimension_numbers<[1], [0], [0], [1], [0, 0, 1, 1], [], []>} : vector<8x128xf32>, vector<128x128xf32>, vector<8x128xf32> -> vector<8x128xf32>
    %c0_13 = arith.constant 0 : index
    %c0_14 = arith.constant 0 : index
    %c0_15 = arith.constant 0 : index
    %18 = vector.load %arg6[%c0_13, %c0_14, %c0_15] : memref<1x1x128xf32, #tpu.memory_space<vmem>>, vector<1x1x128xf32>
    %19 = vector.shape_cast %18 : vector<1x1x128xf32> to vector<1x128xf32>
    %20 = vector.broadcast %19 : vector<1x128xf32> to vector<8x128xf32>
    %21 = arith.addf %17, %20 : vector<8x128xf32>
    %cst_16 = arith.constant 0.000000e+00 : f32
    %22 = vector.broadcast %cst_16 : f32 to vector<8x128xf32>
    %23 = arith.maximumf %21, %22 : vector<8x128xf32>
    %c0_17 = arith.constant 0 : index
    %c0_18 = arith.constant 0 : index
    %c0_19 = arith.constant 0 : index
    %24 = vector.load %arg7[%c0_17, %c0_18, %c0_19] : memref<1x128x256xf32, #tpu.memory_space<vmem>>, vector<1x128x256xf32>
    %25 = vector.shape_cast %24 : vector<1x128x256xf32> to vector<128x256xf32>
    %cst_20 = arith.constant dense<0.000000e+00> : vector<8x256xf32>
    %26 = tpu.matmul %23, %25, %cst_20 {dimension_numbers = #tpu.dot_dimension_numbers<[1], [0], [0], [1], [0, 0, 1, 1], [], []>} : vector<8x128xf32>, vector<128x256xf32>, vector<8x256xf32> -> vector<8x256xf32>
    %c0_21 = arith.constant 0 : index
    %c0_22 = arith.constant 0 : index
    %c0_23 = arith.constant 0 : index
    %27 = vector.load %arg8[%c0_21, %c0_22, %c0_23] : memref<1x1x256xf32, #tpu.memory_space<vmem>>, vector<1x1x256xf32>
    %28 = vector.shape_cast %27 : vector<1x1x256xf32> to vector<1x256xf32>
    %29 = vector.broadcast %28 : vector<1x256xf32> to vector<8x256xf32>
    %30 = arith.addf %26, %29 : vector<8x256xf32>
    %31 = vector.extract_strided_slice %30 {offsets = [0, 0], sizes = [8, 128], strides = [1, 1]} : vector<8x256xf32> to vector<8x128xf32>
    %cst_24 = arith.constant 0.000000e+00 : f32
    %32 = vector.broadcast %cst_24 : f32 to vector<8x128xf32>
    %33 = arith.cmpf olt, %31, %32 : vector<8x128xf32>
    %cst_25 = arith.constant -1.000000e+00 : f32
    %cst_26 = arith.constant 1.000000e+00 : f32
    %34 = vector.broadcast %cst_25 : f32 to vector<8x128xf32>
    %35 = vector.broadcast %cst_26 : f32 to vector<8x128xf32>
    %36 = arith.select %33, %34, %35 : vector<8x128xi1>, vector<8x128xf32>
    %37 = math.absf %31 : vector<8x128xf32>
    %cst_27 = arith.constant 2.41421366 : f32
    %38 = vector.broadcast %cst_27 : f32 to vector<8x128xf32>
    %39 = arith.cmpf ogt, %37, %38 : vector<8x128xf32>
    %cst_28 = arith.constant 2.41421366 : f32
    %40 = vector.broadcast %cst_28 : f32 to vector<8x128xf32>
    %41 = arith.cmpf ole, %37, %40 : vector<8x128xf32>
    %cst_29 = arith.constant 0.414213568 : f32
    %42 = vector.broadcast %cst_29 : f32 to vector<8x128xf32>
    %43 = arith.cmpf ogt, %37, %42 : vector<8x128xf32>
    %44 = arith.andi %41, %43 : vector<8x128xi1>
    %cst_30 = arith.constant 1.000000e-30 : f32
    %45 = vector.broadcast %cst_30 : f32 to vector<8x128xf32>
    %46 = arith.maximumf %37, %45 : vector<8x128xf32>
    %47 = tpu.reciprocal %46 {approx = true} : vector<8x128xf32> -> vector<8x128xf32>
    %48 = arith.mulf %46, %47 : vector<8x128xf32>
    %cst_31 = arith.constant 2.000000e+00 : f32
    %49 = vector.broadcast %cst_31 : f32 to vector<8x128xf32>
    %50 = arith.subf %49, %48 : vector<8x128xf32>
    %51 = arith.mulf %47, %50 : vector<8x128xf32>
    %cst_32 = arith.constant 1.000000e+00 : f32
    %52 = vector.broadcast %cst_32 : f32 to vector<8x128xf32>
    %53 = arith.addf %37, %52 : vector<8x128xf32>
    %54 = tpu.reciprocal %53 {approx = true} : vector<8x128xf32> -> vector<8x128xf32>
    %55 = arith.mulf %53, %54 : vector<8x128xf32>
    %cst_33 = arith.constant 2.000000e+00 : f32
    %56 = vector.broadcast %cst_33 : f32 to vector<8x128xf32>
    %57 = arith.subf %56, %55 : vector<8x128xf32>
    %58 = arith.mulf %54, %57 : vector<8x128xf32>
    %cst_34 = arith.constant 0.000000e+00 : f32
    %59 = vector.broadcast %cst_34 : f32 to vector<8x128xf32>
    %60 = arith.subf %59, %51 : vector<8x128xf32>
    %cst_35 = arith.constant 1.000000e+00 : f32
    %61 = vector.broadcast %cst_35 : f32 to vector<8x128xf32>
    %62 = arith.subf %37, %61 : vector<8x128xf32>
    %63 = arith.mulf %62, %58 : vector<8x128xf32>
    %64 = arith.select %44, %63, %37 : vector<8x128xi1>, vector<8x128xf32>
    %65 = arith.select %39, %60, %64 : vector<8x128xi1>, vector<8x128xf32>
    %cst_36 = arith.constant 0.785398185 : f32
    %cst_37 = arith.constant 0.000000e+00 : f32
    %66 = vector.broadcast %cst_36 : f32 to vector<8x128xf32>
    %67 = vector.broadcast %cst_37 : f32 to vector<8x128xf32>
    %68 = arith.select %44, %66, %67 : vector<8x128xi1>, vector<8x128xf32>
    %cst_38 = arith.constant 1.57079637 : f32
    %69 = vector.broadcast %cst_38 : f32 to vector<8x128xf32>
    %70 = arith.select %39, %69, %68 : vector<8x128xi1>, vector<8x128xf32>
    %71 = arith.mulf %65, %65 : vector<8x128xf32>
    %cst_39 = arith.constant 0.0805374458 : f32
    %72 = vector.broadcast %cst_39 : f32 to vector<8x128xf32>
    %73 = arith.mulf %72, %71 : vector<8x128xf32>
    %cst_40 = arith.constant 0.138776854 : f32
    %74 = vector.broadcast %cst_40 : f32 to vector<8x128xf32>
    %75 = arith.subf %73, %74 : vector<8x128xf32>
    %76 = arith.mulf %75, %71 : vector<8x128xf32>
    %cst_41 = arith.constant 0.199777111 : f32
    %77 = vector.broadcast %cst_41 : f32 to vector<8x128xf32>
    %78 = arith.addf %76, %77 : vector<8x128xf32>
    %79 = arith.mulf %78, %71 : vector<8x128xf32>
    %cst_42 = arith.constant 0.333329499 : f32
    %80 = vector.broadcast %cst_42 : f32 to vector<8x128xf32>
    %81 = arith.subf %79, %80 : vector<8x128xf32>
    %82 = arith.mulf %81, %71 : vector<8x128xf32>
    %83 = arith.mulf %82, %65 : vector<8x128xf32>
    %84 = arith.addf %83, %65 : vector<8x128xf32>
    %85 = arith.addf %70, %84 : vector<8x128xf32>
    %86 = arith.mulf %36, %85 : vector<8x128xf32>
    %cst_43 = arith.constant 1.272000e+00 : f32
    %87 = vector.broadcast %cst_43 : f32 to vector<8x128xf32>
    %88 = arith.mulf %87, %86 : vector<8x128xf32>
    %89 = math.exp %88 : vector<8x128xf32>
    %90 = arith.mulf %89, %4 : vector<8x128xf32>
    %91 = vector.extract_strided_slice %30 {offsets = [0, 128], sizes = [8, 128], strides = [1, 1]} : vector<8x256xf32> to vector<8x128xf32>
    %92 = arith.addf %90, %91 : vector<8x128xf32>
    %c0_44 = arith.constant 0 : index
    %c0_45 = arith.constant 0 : index
    %c0_46 = arith.constant 0 : index
    %93 = vector.load %arg9[%c0_44, %c0_45, %c0_46] : memref<1x128x128xf32, #tpu.memory_space<vmem>>, vector<1x128x128xf32>
    %94 = vector.shape_cast %93 : vector<1x128x128xf32> to vector<128x128xf32>
    %cst_47 = arith.constant dense<0.000000e+00> : vector<8x128xf32>
    %95 = tpu.matmul %92, %94, %cst_47 {dimension_numbers = #tpu.dot_dimension_numbers<[1], [0], [0], [1], [0, 0, 1, 1], [], []>} : vector<8x128xf32>, vector<128x128xf32>, vector<8x128xf32> -> vector<8x128xf32>
    %c0_48 = arith.constant 0 : index
    %c0_49 = arith.constant 0 : index
    %c0_50 = arith.constant 0 : index
    %96 = vector.load %arg10[%c0_48, %c0_49, %c0_50] : memref<1x1x128xf32, #tpu.memory_space<vmem>>, vector<1x1x128xf32>
    %97 = vector.shape_cast %96 : vector<1x1x128xf32> to vector<1x128xf32>
    %98 = vector.broadcast %97 : vector<1x128xf32> to vector<8x128xf32>
    %99 = arith.addf %95, %98 : vector<8x128xf32>
    %cst_51 = arith.constant 0.000000e+00 : f32
    %100 = vector.broadcast %cst_51 : f32 to vector<8x128xf32>
    %101 = arith.maximumf %99, %100 : vector<8x128xf32>
    %c0_52 = arith.constant 0 : index
    %c0_53 = arith.constant 0 : index
    %c0_54 = arith.constant 0 : index
    %102 = vector.load %arg11[%c0_52, %c0_53, %c0_54] : memref<1x128x128xf32, #tpu.memory_space<vmem>>, vector<1x128x128xf32>
    %103 = vector.shape_cast %102 : vector<1x128x128xf32> to vector<128x128xf32>
    %cst_55 = arith.constant dense<0.000000e+00> : vector<8x128xf32>
    %104 = tpu.matmul %101, %103, %cst_55 {dimension_numbers = #tpu.dot_dimension_numbers<[1], [0], [0], [1], [0, 0, 1, 1], [], []>} : vector<8x128xf32>, vector<128x128xf32>, vector<8x128xf32> -> vector<8x128xf32>
    %c0_56 = arith.constant 0 : index
    %c0_57 = arith.constant 0 : index
    %c0_58 = arith.constant 0 : index
    %105 = vector.load %arg12[%c0_56, %c0_57, %c0_58] : memref<1x1x128xf32, #tpu.memory_space<vmem>>, vector<1x1x128xf32>
    %106 = vector.shape_cast %105 : vector<1x1x128xf32> to vector<1x128xf32>
    %107 = vector.broadcast %106 : vector<1x128xf32> to vector<8x128xf32>
    %108 = arith.addf %104, %107 : vector<8x128xf32>
    %cst_59 = arith.constant 0.000000e+00 : f32
    %109 = vector.broadcast %cst_59 : f32 to vector<8x128xf32>
    %110 = arith.maximumf %108, %109 : vector<8x128xf32>
    %c0_60 = arith.constant 0 : index
    %c0_61 = arith.constant 0 : index
    %c0_62 = arith.constant 0 : index
    %111 = vector.load %arg13[%c0_60, %c0_61, %c0_62] : memref<1x128x256xf32, #tpu.memory_space<vmem>>, vector<1x128x256xf32>
    %112 = vector.shape_cast %111 : vector<1x128x256xf32> to vector<128x256xf32>
    %cst_63 = arith.constant dense<0.000000e+00> : vector<8x256xf32>
    %113 = tpu.matmul %110, %112, %cst_63 {dimension_numbers = #tpu.dot_dimension_numbers<[1], [0], [0], [1], [0, 0, 1, 1], [], []>} : vector<8x128xf32>, vector<128x256xf32>, vector<8x256xf32> -> vector<8x256xf32>
    %c0_64 = arith.constant 0 : index
    %c0_65 = arith.constant 0 : index
    %c0_66 = arith.constant 0 : index
    %114 = vector.load %arg14[%c0_64, %c0_65, %c0_66] : memref<1x1x256xf32, #tpu.memory_space<vmem>>, vector<1x1x256xf32>
    %115 = vector.shape_cast %114 : vector<1x1x256xf32> to vector<1x256xf32>
    %116 = vector.broadcast %115 : vector<1x256xf32> to vector<8x256xf32>
    %117 = arith.addf %113, %116 : vector<8x256xf32>
    %118 = vector.extract_strided_slice %117 {offsets = [0, 0], sizes = [8, 128], strides = [1, 1]} : vector<8x256xf32> to vector<8x128xf32>
    %cst_67 = arith.constant 0.000000e+00 : f32
    %119 = vector.broadcast %cst_67 : f32 to vector<8x128xf32>
    %120 = arith.cmpf olt, %118, %119 : vector<8x128xf32>
    %cst_68 = arith.constant -1.000000e+00 : f32
    %cst_69 = arith.constant 1.000000e+00 : f32
    %121 = vector.broadcast %cst_68 : f32 to vector<8x128xf32>
    %122 = vector.broadcast %cst_69 : f32 to vector<8x128xf32>
    %123 = arith.select %120, %121, %122 : vector<8x128xi1>, vector<8x128xf32>
    %124 = math.absf %118 : vector<8x128xf32>
    %cst_70 = arith.constant 2.41421366 : f32
    %125 = vector.broadcast %cst_70 : f32 to vector<8x128xf32>
    %126 = arith.cmpf ogt, %124, %125 : vector<8x128xf32>
    %cst_71 = arith.constant 2.41421366 : f32
    %127 = vector.broadcast %cst_71 : f32 to vector<8x128xf32>
    %128 = arith.cmpf ole, %124, %127 : vector<8x128xf32>
    %cst_72 = arith.constant 0.414213568 : f32
    %129 = vector.broadcast %cst_72 : f32 to vector<8x128xf32>
    %130 = arith.cmpf ogt, %124, %129 : vector<8x128xf32>
    %131 = arith.andi %128, %130 : vector<8x128xi1>
    %cst_73 = arith.constant 1.000000e-30 : f32
    %132 = vector.broadcast %cst_73 : f32 to vector<8x128xf32>
    %133 = arith.maximumf %124, %132 : vector<8x128xf32>
    %134 = tpu.reciprocal %133 {approx = true} : vector<8x128xf32> -> vector<8x128xf32>
    %135 = arith.mulf %133, %134 : vector<8x128xf32>
    %cst_74 = arith.constant 2.000000e+00 : f32
    %136 = vector.broadcast %cst_74 : f32 to vector<8x128xf32>
    %137 = arith.subf %136, %135 : vector<8x128xf32>
    %138 = arith.mulf %134, %137 : vector<8x128xf32>
    %cst_75 = arith.constant 1.000000e+00 : f32
    %139 = vector.broadcast %cst_75 : f32 to vector<8x128xf32>
    %140 = arith.addf %124, %139 : vector<8x128xf32>
    %141 = tpu.reciprocal %140 {approx = true} : vector<8x128xf32> -> vector<8x128xf32>
    %142 = arith.mulf %140, %141 : vector<8x128xf32>
    %cst_76 = arith.constant 2.000000e+00 : f32
    %143 = vector.broadcast %cst_76 : f32 to vector<8x128xf32>
    %144 = arith.subf %143, %142 : vector<8x128xf32>
    %145 = arith.mulf %141, %144 : vector<8x128xf32>
    %cst_77 = arith.constant 0.000000e+00 : f32
    %146 = vector.broadcast %cst_77 : f32 to vector<8x128xf32>
    %147 = arith.subf %146, %138 : vector<8x128xf32>
    %cst_78 = arith.constant 1.000000e+00 : f32
    %148 = vector.broadcast %cst_78 : f32 to vector<8x128xf32>
    %149 = arith.subf %124, %148 : vector<8x128xf32>
    %150 = arith.mulf %149, %145 : vector<8x128xf32>
    %151 = arith.select %131, %150, %124 : vector<8x128xi1>, vector<8x128xf32>
    %152 = arith.select %126, %147, %151 : vector<8x128xi1>, vector<8x128xf32>
    %cst_79 = arith.constant 0.785398185 : f32
    %cst_80 = arith.constant 0.000000e+00 : f32
    %153 = vector.broadcast %cst_79 : f32 to vector<8x128xf32>
    %154 = vector.broadcast %cst_80 : f32 to vector<8x128xf32>
    %155 = arith.select %131, %153, %154 : vector<8x128xi1>, vector<8x128xf32>
    %cst_81 = arith.constant 1.57079637 : f32
    %156 = vector.broadcast %cst_81 : f32 to vector<8x128xf32>
    %157 = arith.select %126, %156, %155 : vector<8x128xi1>, vector<8x128xf32>
    %158 = arith.mulf %152, %152 : vector<8x128xf32>
    %cst_82 = arith.constant 0.0805374458 : f32
    %159 = vector.broadcast %cst_82 : f32 to vector<8x128xf32>
    %160 = arith.mulf %159, %158 : vector<8x128xf32>
    %cst_83 = arith.constant 0.138776854 : f32
    %161 = vector.broadcast %cst_83 : f32 to vector<8x128xf32>
    %162 = arith.subf %160, %161 : vector<8x128xf32>
    %163 = arith.mulf %162, %158 : vector<8x128xf32>
    %cst_84 = arith.constant 0.199777111 : f32
    %164 = vector.broadcast %cst_84 : f32 to vector<8x128xf32>
    %165 = arith.addf %163, %164 : vector<8x128xf32>
    %166 = arith.mulf %165, %158 : vector<8x128xf32>
    %cst_85 = arith.constant 0.333329499 : f32
    %167 = vector.broadcast %cst_85 : f32 to vector<8x128xf32>
    %168 = arith.subf %166, %167 : vector<8x128xf32>
    %169 = arith.mulf %168, %158 : vector<8x128xf32>
    %170 = arith.mulf %169, %152 : vector<8x128xf32>
    %171 = arith.addf %170, %152 : vector<8x128xf32>
    %172 = arith.addf %157, %171 : vector<8x128xf32>
    %173 = arith.mulf %123, %172 : vector<8x128xf32>
    %cst_86 = arith.constant 1.272000e+00 : f32
    %174 = vector.broadcast %cst_86 : f32 to vector<8x128xf32>
    %175 = arith.mulf %174, %173 : vector<8x128xf32>
    %176 = math.exp %175 : vector<8x128xf32>
    %177 = arith.mulf %176, %5 : vector<8x128xf32>
    %178 = vector.extract_strided_slice %117 {offsets = [0, 128], sizes = [8, 128], strides = [1, 1]} : vector<8x256xf32> to vector<8x128xf32>
    %179 = arith.addf %177, %178 : vector<8x128xf32>
    %c0_87 = arith.constant 0 : index
    %c0_88 = arith.constant 0 : index
    %180 = vector.load %arg19[%c0_87, %c0_88] : memref<8x128xf32, #tpu.memory_space<vmem>>, vector<8x128xf32>
    %181 = arith.addf %88, %175 : vector<8x128xf32>
    %182 = arith.addf %180, %181 : vector<8x128xf32>
    %c0_89 = arith.constant 0 : index
    %c0_90 = arith.constant 0 : index
    %183 = vector.load %arg19[%c0_89, %c0_90] : memref<8x128xf32, #tpu.memory_space<vmem>>, vector<8x128xf32>
    tpu.vector_store %arg19[%c0_89, %c0_90], %182 {strides = array<i32>} : memref<8x128xf32, #tpu.memory_space<vmem>>, vector<8x128xf32>,
    %c0_91 = arith.constant 0 : index
    %c0_92 = arith.constant 0 : index
    %c0_93 = arith.constant 0 : index
    %184 = vector.load %arg15[%c0_91, %c0_92, %c0_93] : memref<1x256x256xf32, #tpu.memory_space<vmem>>, vector<1x256x256xf32>
    %185 = vector.shape_cast %184 : vector<1x256x256xf32> to vector<256x256xf32>
    %186 = vector.extract_strided_slice %185 {offsets = [0, 0], sizes = [128, 256], strides = [1, 1]} : vector<256x256xf32> to vector<128x256xf32>
    %cst_94 = arith.constant dense<0.000000e+00> : vector<8x256xf32>
    %187 = tpu.matmul %92, %186, %cst_94 {dimension_numbers = #tpu.dot_dimension_numbers<[1], [0], [0], [1], [0, 0, 1, 1], [], []>} : vector<8x128xf32>, vector<128x256xf32>, vector<8x256xf32> -> vector<8x256xf32>
    %188 = vector.extract_strided_slice %185 {offsets = [128, 0], sizes = [128, 256], strides = [1, 1]} : vector<256x256xf32> to vector<128x256xf32>
    %cst_95 = arith.constant dense<0.000000e+00> : vector<8x256xf32>
    %189 = tpu.matmul %179, %188, %cst_95 {dimension_numbers = #tpu.dot_dimension_numbers<[1], [0], [0], [1], [0, 0, 1, 1], [], []>} : vector<8x128xf32>, vector<128x256xf32>, vector<8x256xf32> -> vector<8x256xf32>
    %190 = arith.addf %187, %189 : vector<8x256xf32>
    %c0_96 = arith.constant 0 : index
    %c0_97 = arith.constant 0 : index
    %191 = vector.load %arg18[%c0_96, %c0_97] : memref<8x256xf32, #tpu.memory_space<vmem>>, vector<8x256xf32>
    tpu.vector_store %arg18[%c0_96, %c0_97], %190 {strides = array<i32>} : memref<8x256xf32, #tpu.memory_space<vmem>>, vector<8x256xf32>,
    %c2_i32 = arith.constant 2 : i32
    %192 = arith.cmpi eq, %arg1, %c2_i32 : i32
    %193 = arith.extui %192 : i1 to i32
    %c0_i32_98 = arith.constant 0 : i32
    %194 = arith.cmpi ne, %193, %c0_i32_98 : i32
    scf.if %194 {
      %c0_99 = arith.constant 0 : index
      %c0_100 = arith.constant 0 : index
      %195 = vector.load %arg18[%c0_99, %c0_100] : memref<8x256xf32, #tpu.memory_space<vmem>>, vector<8x256xf32>
      %c0_101 = arith.constant 0 : index
      %c0_102 = arith.constant 0 : index
      %196 = vector.load %arg16[%c0_101, %c0_102] : memref<8x256xf32, #tpu.memory_space<vmem>>, vector<8x256xf32>
      tpu.vector_store %arg16[%c0_101, %c0_102], %195 {strides = array<i32>} : memref<8x256xf32, #tpu.memory_space<vmem>>, vector<8x256xf32>,
      %c0_103 = arith.constant 0 : index
      %c0_104 = arith.constant 0 : index
      %197 = vector.load %arg19[%c0_103, %c0_104] : memref<8x128xf32, #tpu.memory_space<vmem>>, vector<8x128xf32>
      %cst_105 = arith.constant dense<0.000000e+00> : vector<8xf32>
      %198 = vector.multi_reduction <add>, %197, %cst_105 [1] : vector<8x128xf32> to vector<8xf32>
      %199 = vector.shape_cast %198 : vector<8xf32> to vector<8x1xf32>
      %200 = vector.shape_cast %199 : vector<8x1xf32> to vector<8x1xf32>
      %201 = vector.broadcast %200 : vector<8x1xf32> to vector<8x128xf32>
      %c0_106 = arith.constant 0 : index
      %c0_107 = arith.constant 0 : index
      %202 = vector.load %arg17[%c0_106, %c0_107] : memref<8x128xf32, #tpu.memory_space<vmem>>, vector<8x128xf32>
      tpu.vector_store %arg17[%c0_106, %c0_107], %201 {strides = array<i32>} : memref<8x128xf32, #tpu.memory_space<vmem>>, vector<8x128xf32>,
    } else {
    }
    return
  }
  func.func @transform_0(%arg0: i32, %arg1: i32) -> (i32, i32) {
    %c0_i32 = arith.constant 0 : i32
    %c0_i32_0 = arith.constant 0 : i32
    return %arg0, %c0_i32 : i32, i32
  }
  func.func @transform_1(%arg0: i32, %arg1: i32) -> (i32, i32, i32) {
    %c0_i32 = arith.constant 0 : i32
    %c0_i32_0 = arith.constant 0 : i32
    %c0_i32_1 = arith.constant 0 : i32
    return %arg1, %c0_i32, %c0_i32_0 : i32, i32, i32
  }
  func.func @transform_2(%arg0: i32, %arg1: i32) -> (i32, i32, i32) {
    %c0_i32 = arith.constant 0 : i32
    %c0_i32_0 = arith.constant 0 : i32
    %c0_i32_1 = arith.constant 0 : i32
    return %arg1, %c0_i32, %c0_i32_0 : i32, i32, i32
  }
  func.func @transform_3(%arg0: i32, %arg1: i32) -> (i32, i32, i32) {
    %c0_i32 = arith.constant 0 : i32
    %c0_i32_0 = arith.constant 0 : i32
    %c0_i32_1 = arith.constant 0 : i32
    return %arg1, %c0_i32, %c0_i32_0 : i32, i32, i32
  }
  func.func @transform_4(%arg0: i32, %arg1: i32) -> (i32, i32, i32) {
    %c0_i32 = arith.constant 0 : i32
    %c0_i32_0 = arith.constant 0 : i32
    %c0_i32_1 = arith.constant 0 : i32
    return %arg1, %c0_i32, %c0_i32_0 : i32, i32, i32
  }
  func.func @transform_5(%arg0: i32, %arg1: i32) -> (i32, i32, i32) {
    %c0_i32 = arith.constant 0 : i32
    %c0_i32_0 = arith.constant 0 : i32
    %c0_i32_1 = arith.constant 0 : i32
    return %arg1, %c0_i32, %c0_i32_0 : i32, i32, i32
  }
  func.func @transform_6(%arg0: i32, %arg1: i32) -> (i32, i32, i32) {
    %c0_i32 = arith.constant 0 : i32
    %c0_i32_0 = arith.constant 0 : i32
    %c0_i32_1 = arith.constant 0 : i32
    return %arg1, %c0_i32, %c0_i32_0 : i32, i32, i32
  }
  func.func @transform_7(%arg0: i32, %arg1: i32) -> (i32, i32, i32) {
    %c0_i32 = arith.constant 0 : i32
    %c0_i32_0 = arith.constant 0 : i32
    %c0_i32_1 = arith.constant 0 : i32
    return %arg1, %c0_i32, %c0_i32_0 : i32, i32, i32
  }
  func.func @transform_8(%arg0: i32, %arg1: i32) -> (i32, i32, i32) {
    %c0_i32 = arith.constant 0 : i32
    %c0_i32_0 = arith.constant 0 : i32
    %c0_i32_1 = arith.constant 0 : i32
    return %arg1, %c0_i32, %c0_i32_0 : i32, i32, i32
  }
  func.func @transform_9(%arg0: i32, %arg1: i32) -> (i32, i32, i32) {
    %c0_i32 = arith.constant 0 : i32
    %c0_i32_0 = arith.constant 0 : i32
    %c0_i32_1 = arith.constant 0 : i32
    return %arg1, %c0_i32, %c0_i32_0 : i32, i32, i32
  }
  func.func @transform_10(%arg0: i32, %arg1: i32) -> (i32, i32, i32) {
    %c0_i32 = arith.constant 0 : i32
    %c0_i32_0 = arith.constant 0 : i32
    %c0_i32_1 = arith.constant 0 : i32
    return %arg1, %c0_i32, %c0_i32_0 : i32, i32, i32
  }
  func.func @transform_11(%arg0: i32, %arg1: i32) -> (i32, i32, i32) {
    %c0_i32 = arith.constant 0 : i32
    %c0_i32_0 = arith.constant 0 : i32
    %c0_i32_1 = arith.constant 0 : i32
    return %arg1, %c0_i32, %c0_i32_0 : i32, i32, i32
  }
  func.func @transform_12(%arg0: i32, %arg1: i32) -> (i32, i32, i32) {
    %c0_i32 = arith.constant 0 : i32
    %c0_i32_0 = arith.constant 0 : i32
    %c0_i32_1 = arith.constant 0 : i32
    return %arg1, %c0_i32, %c0_i32_0 : i32, i32, i32
  }
  func.func @transform_13(%arg0: i32, %arg1: i32) -> (i32, i32, i32) {
    %c0_i32 = arith.constant 0 : i32
    %c0_i32_0 = arith.constant 0 : i32
    %c0_i32_1 = arith.constant 0 : i32
    return %arg1, %c0_i32, %c0_i32_0 : i32, i32, i32
  }
  func.func @transform_14(%arg0: i32, %arg1: i32) -> (i32, i32) {
    %c0_i32 = arith.constant 0 : i32
    %c0_i32_0 = arith.constant 0 : i32
    return %arg0, %c0_i32 : i32, i32
  }
  func.func @transform_15(%arg0: i32, %arg1: i32) -> (i32, i32) {
    %c0_i32 = arith.constant 0 : i32
    %c0_i32_0 = arith.constant 0 : i32
    return %arg0, %c0_i32 : i32, i32
  }
}

</mosaic_0001>

<bundles_post_ra>
// kernel: tpu_custom_call.1
= control target key start
LH: loop header
LB: loop body
LE: loop exit
PB: predicated region body
PF: predicated region fallthrough
CT: control target
= control target key end

     0   :  { %s4087_s0 = inlined_call_operand.hbm [shape: f32[16,256], index: 0, kind: input, shape index: {}]   ;;  %s4088_s1 = inlined_call_operand.hbm [shape: f32[3,128,128], index: 1, kind: input, shape index: {}]   ;;  %s4089_s2 = inlined_call_operand.hbm [shape: f32[3,1,128], index: 2, kind: input, shape index: {}]   ;;  %s4090_s3 = inlined_call_operand.hbm [shape: f32[3,128,128], index: 3, kind: input, shape index: {}]   ;;  %s4091_s4 = inlined_call_operand.hbm [shape: f32[3,1,128], index: 4, kind: input, shape index: {}]   ;;  %s4092_s5 = inlined_call_operand.hbm [shape: f32[3,128,256], index: 5, kind: input, shape index: {}]   ;;  %s4093_s6 = inlined_call_operand.vmem [shape: f32[3,1,256], index: 6, kind: input, shape index: {}]   ;;  %s4094_s7 = inlined_call_operand.hbm [shape: f32[3,128,128], index: 7, kind: input, shape index: {}]   ;;  %s4095_s8 = inlined_call_operand.hbm [shape: f32[3,1,128], index: 8, kind: input, shape index: {}]   ;;  %s4096_s9 = inlined_call_operand.hbm [shape: f32[3,128,128], index: 9, kind: input, shape index: {}]   ;;  %s4097_s10 = inlined_call_operand.vmem [shape: f32[3,1,128], index: 10, kind: input, shape index: {}]   ;;  %s4098_s11 = inlined_call_operand.hbm [shape: f32[3,128,256], index: 11, kind: input, shape index: {}]   ;;  %s4099_s12 = inlined_call_operand.vmem [shape: f32[3,1,256], index: 12, kind: input, shape index: {}]   ;;  %s4100_s13 = inlined_call_operand.hbm [shape: f32[3,256,256], index: 13, kind: input, shape index: {}]   ;;  %s4101_s14 = inlined_call_operand.hbm [shape: f32[16,256], index: 14, kind: output, shape index: {0}]   ;;  %s4102_s15 = inlined_call_operand.hbm [shape: f32[16,128], index: 15, kind: output, shape index: {1}]  }
   0x1   :  { %4140 = sst [smem:[#allocation50_spill]] %s4087_s0 }
   0x2   :  { %4141 = sst [smem:[#allocation51_spill]] %s4088_s1 }
   0x3   :  { %4142 = sst [smem:[#allocation52_spill]] %s4089_s2 }
   0x4   :  { %4143 = sst [smem:[#allocation53_spill]] %s4090_s3 }
   0x5   :  { %4144 = sst [smem:[#allocation54_spill]] %s4091_s4 }
   0x6   :  { %4145 = sst [smem:[#allocation55_spill]] %s4092_s5 }
   0x7   :  { %4146 = sst [smem:[#allocation56_spill]] %s4093_s6 }
   0x8   :  { %4147 = sst [smem:[#allocation57_spill]] %s4094_s7 }
   0x9   :  { %4148 = sst [smem:[#allocation58_spill]] %s4095_s8 }
   0xa   :  { %4149 = sst [smem:[#allocation59_spill]] %s4096_s9 }
   0xb   :  { %4150 = sst [smem:[#allocation60_spill]] %s4097_s10 }
   0xc   :  { %4151 = sst [smem:[#allocation61_spill]] %s4098_s11 }
   0xd   :  { %4152 = sst [smem:[#allocation62_spill]] %s4099_s12 }
   0xe   :  { %4153 = sst [smem:[#allocation63_spill]] %s4100_s13 }
   0xf   :  { %4154 = sst [smem:[#allocation64_spill]] %s4101_s14 }
  0x10   :  { %4155 = sst [smem:[#allocation65_spill]] %s4102_s15 }
  0x11   :  { %21 = vsyncpa [#allocation5], 0 }
  0x12   :  { %23 = vsyncpa [#allocation5 + $0x1], 0 }
  0x13   :  { %24 = vsyncpa [#allocation8], 0 }
  0x14   :  { %26 = vsyncpa [#allocation8 + $0x1], 0 }
  0x15   :  { %27 = vsyncpa [#allocation11], 0 }
  0x16   :  { %29 = vsyncpa [#allocation11 + $0x1], 0 }
  0x17   :  { %30 = vsyncpa [#allocation14], 0 }
  0x18   :  { %32 = vsyncpa [#allocation14 + $0x1], 0 }
  0x19   :  { %33 = vsyncpa [#allocation17], 0 }
  0x1a   :  { %35 = vsyncpa [#allocation17 + $0x1], 0 }
  0x1b   :  { %36 = vsyncpa [#allocation20], 0 }
  0x1c   :  { %38 = vsyncpa [#allocation20 + $0x1], 0 }
  0x1d   :  { %39 = vsyncpa [#allocation6], 0 }
  0x1e   :  { %41 = vsyncpa [#allocation6 + $0x1], 0 }
  0x1f   :  { %42 = vsyncpa [#allocation24], 0 }
  0x20   :  { %44 = vsyncpa [#allocation24 + $0x1], 0  ;;  %s3295_s18 = smov 0   ;;  %s3297_s19 = smov 0  }
  0x21   :  { %s3299_s20 = smov 0   ;;  %s3301_s21 = smov 0  }
  0x22   :  { %s3303_s22 = smov 0   ;;  %s3305_s23 = smov 0  }
  0x23   :  { %s3307_s24 = smov 0   ;;  %s3309_s25 = smov 0  }
  0x24   :  { %s3311_s26 = smov 0   ;;  %s3313_s27 = smov 0  }
  0x25   :  { %s3315_s28 = smov 0  }
  0x26 LB: > { %4156 = sst [smem:[#allocation33_spill]] %s3152_s18  ;;  %p77_p0 = scmp.eq.s32.totalorder %s3192_s28, 0  ;;  %s3192_s28 = sphi %s3315_s28, %s50_s28   ;;  %s3188_s27 = sphi %s3313_s27, %s4240_s27   ;;  %s3184_s26 = sphi %s3311_s26, %s4239_s26   ;;  %s3180_s25 = sphi %s3309_s25, %s4238_s25   ;;  %s3176_s24 = sphi %s3307_s24, %s4237_s24   ;;  %s3172_s23 = sphi %s3305_s23, %s4236_s23   ;;  %s3168_s22 = sphi %s3303_s22, %s4235_s22   ;;  %s3164_s21 = sphi %s3301_s21, %s4234_s21   ;;  %s3160_s20 = sphi %s3299_s20, %s4233_s20   ;;  %s3156_s19 = sphi %s3297_s19, %s4232_s19   ;;  %s3152_s18 = sphi %s3295_s18, %s4231_s18  }
  0x27   : > { %4157 = sst [smem:[#allocation34_spill]] %s3156_s19  ;;  %p102_p1 = scmp.ne.s32.totalorder %s3160_s20, %s3156_s19 }
  0x28   : > { %4158 = sst [smem:[#allocation35_spill]] %s3160_s20  ;;  %p4124_p2 = scmp.lt.s32.totalorder %s3192_s28, 6 }
  0x29   : > { %4159 = sst [smem:[#allocation36_spill]] %s3164_s21  ;;  %p104_p3 = por %p102_p1, %p77_p0 }
  0x2a   : > { %4160 = sst [smem:[#allocation37_spill]] %s3168_s22  ;;  %s3357_s29 = sand.u32 1, %s3192_s28  }
  0x2b   : > { %4161 = sst [smem:[#allocation38_spill]] %s3172_s23  ;;  %s3360_s30 = sand.u32 1, %s3160_s20  }
  0x2c   : > { %4162 = sst [smem:[#allocation39_spill]] %s3176_s24  ;;  %s3363_s16 = sshll.u32 %s3360_s30, 7 }
  0x2d   : > { %4163 = sst [smem:[#allocation40_spill]] %s3180_s25  ;;  %s3366_s17 = sshll.u32 %s3184_s26, 11 }
  0x2e   : > { %4164 = sst [smem:[#allocation41_spill]] %s3184_s26  ;;  %s519_s12 = scalar_lea.vmem [#allocation7], %s3363_s16 }
  0x2f   : > { %4165 = sst [smem:[#allocation42_spill]] %s3188_s27  ;;  %s526_s6 = sshll.u32 %s519_s12, 4  ;;  %s527_s6 = int_to_ptr.vmem [resolvable:$true] %s526_s6 }
  0x30   : > { %4166 = sst [smem:[#allocation43_spill]] %s3192_s28  ;;  %p3375_p4 = pnand %p4124_p2, %p104_p3 }
  0x31   : > { %4167 = sst [smem:[#allocation44_spill]] %s3363_s16  ;;  %s2727_s9 = scalar_lea.vmem %s527_s6, 2048 }
  0x32   : > { %s4168_s1 = sld [smem:[#allocation51_spill]]  ;;  %p3382_p5 = pneg %p3375_p4 }
  0x33   : > { %p2728_p6 = scmp.ne.s32.totalorder %s527_s6, %s2727_s9  ;;  %s3194_s12 = smov [#allocation7]  }
  0x34   : > { %s2732_s14 = sshll.u32 %s3194_s12, 4  ;;  %s2733_s14 = int_to_ptr.vmem [resolvable:$false] %s2732_s14 }
  0x35   : > { %p2730_p7 = pnand %p2728_p6, %p3382_p5  ;;  %s2734_s15 = scalar_lea.vmem %s2733_s14, 4096 }
  0x36   : > { %p2735_p9 = scmp.lt.s32.totalorder %s527_s6, %s2733_s14  ;;  %p2736_p10 = scmp.lt.s32.totalorder %s2734_s15, %s2727_s9 }
  0x37   : > { %p2731_p8 = pneg %p2730_p7 }
  0x38   : > { %s525_s25 = scalar_lea.hbm %s4168_s1, %s3366_s17  ;;  %p2737_p11 = por %p2736_p10, %p2735_p9 }
  0x3a   : > { %p2738_p12 = pnand %p2737_p11, %p2731_p8 }
  0x3c   : > { %2741 = shalt.err (!%p2738_p12)
}
  0x3d   : > { %s4111_s24 = smov 128   ;;  %s4113_s1 = smov 8  }
  0x3e   : > { %s4171_s12 = scalar_lea.sflag [#allocation8], %s3357_s29  ;;  %p2288_p13 = scmp.ge.s32.totalorder %s3192_s28, 1 }
  0x3f   : > { %2569 = dma.hbm_to_vmem [thread:$0]  (!%p3375_p4), %s525_s25, 2048, %s527_s6, %s4171_s12, %s4111_s24, %s4111_s24, %s4113_s1  }
  0x40   : > { %p731_p1 = scmp.lt.s32.totalorder %s3192_s28, 7  ;;  %s4174_s3 = sld [smem:[#allocation53_spill]] }
  0x41   : > { %s557_s4 = scalar_lea.vmem [#allocation10], %s3363_s16  ;;  %s4116_s0 = sshll.u32 %s3360_s30, 8 }
  0x42   : > { %p3397_p3 = pnand %p2288_p13, %p731_p1  ;;  %s564_s2 = sshll.u32 %s557_s4, 4  ;;  %s565_s2 = int_to_ptr.vmem [resolvable:$true] %s564_s2 }
  0x43   : > { %s4115_s19 = scalar_lea.sflag [#allocation11], %s3357_s29  ;;  %s2755_s18 = scalar_lea.vmem %s565_s2, 2048 }
  0x44   : > { %s4172_s9 = scalar_select %p3397_p3, 1, 0 }
  0x45   : > { %p2756_p6 = scmp.ne.s32.totalorder %s565_s2, %s2755_s18  ;;  %s3197_s6 = smov [#allocation10]  }
  0x46   : > { %4173 = sst [smem:[#allocation45_spill]] %s4172_s9  ;;  %s563_s7 = scalar_lea.hbm %s4174_s3, %s3366_s17 }
  0x47   : > { %p2758_p7 = pnand %p2756_p6, %p3382_p5  ;;  %s2760_s25 = sshll.u32 %s3197_s6, 4  ;;  %s2761_s25 = int_to_ptr.vmem [resolvable:$false] %s2760_s25 }
  0x48   : > { %s2762_s12 = scalar_lea.vmem %s2761_s25, 4096  ;;  %p2763_p9 = scmp.lt.s32.totalorder %s565_s2, %s2761_s25 }
  0x49   : > { %p2759_p8 = pneg %p2758_p7  ;;  %p2764_p10 = scmp.lt.s32.totalorder %s2762_s12, %s2755_s18 }
  0x4b   : > { %p2765_p11 = por %p2764_p10, %p2763_p9 }
  0x4d   : > { %p2766_p12 = pnand %p2765_p11, %p2759_p8 }
  0x4f   : > { %2769 = shalt.err (!%p2766_p12)
}
  0x50   : > { %2575 = dma.hbm_to_vmem [thread:$0]  (!%p3375_p4), %s563_s7, 2048, %s565_s2, %s4115_s19, %s4111_s24, %s4111_s24, %s4113_s1  }
  0x51   : > { %s4117_s4 = sshll.u32 %s3184_s26, 12  ;;  %s4175_s5 = sld [smem:[#allocation55_spill]] }
  0x52   : > { %s595_s6 = scalar_lea.vmem [#allocation13], %s4116_s0  ;;  %s3426_s12 = sshll.u32 %s3184_s26, 4 }
  0x53   : > { %s602_s25 = sshll.u32 %s595_s6, 4  ;;  %s4118_s3 = scalar_lea.sflag [#allocation14], %s3357_s29  ;;  %s603_s25 = int_to_ptr.vmem [resolvable:$true] %s602_s25 }
  0x54   : > { %s2783_s9 = scalar_lea.vmem %s603_s25, 4096  ;;  %s3198_s16 = smov [#allocation13]  }
  0x55   : > { %p2784_p13 = scmp.ne.s32.totalorder %s603_s25, %s2783_s9  ;;  %s2788_s2 = sshll.u32 %s3198_s16, 4  ;;  %s2789_s2 = int_to_ptr.vmem [resolvable:$false] %s2788_s2 }
  0x56   : > { %s2790_s7 = scalar_lea.vmem %s2789_s2, 8192  ;;  %p2791_p7 = scmp.lt.s32.totalorder %s603_s25, %s2789_s2 }
  0x57   : > { %s601_s15 = scalar_lea.hbm %s4175_s5, %s4117_s4  ;;  %p2786_p1 = pnand %p2784_p13, %p3382_p5 }
  0x58   : > { %p2792_p8 = scmp.lt.s32.totalorder %s2790_s7, %s2783_s9 }
  0x59   : > { %p2787_p6 = pneg %p2786_p1 }
  0x5a   : > { %p2793_p9 = por %p2792_p8, %p2791_p7 }
  0x5c   : > { %p2794_p10 = pnand %p2793_p9, %p2787_p6 }
  0x5e   : > { %2797 = shalt.err (!%p2794_p10)
}
  0x5f   : > { %s4119_s18 = smov 256   ;;  %s4121_s14 = smov 16  }
  0x60   : > { %2581 = dma.hbm_to_vmem [thread:$0]  (!%p3375_p4), %s601_s15, 4096, %s603_s25, %s4118_s3, %s4119_s18, %s4119_s18, %s4121_s14  }
  0x61   : > { %s4176_s8 = sld [smem:[#allocation58_spill]]  ;;  %s643_s2 = scalar_lea.vmem [#allocation16], %s3360_s30 }
  0x62   : > { %s650_s7 = sshll.u32 %s643_s2, 4  ;;  %s4125_s24 = scalar_lea.sflag [#allocation17], %s3357_s29  ;;  %s651_s7 = int_to_ptr.vmem [resolvable:$true] %s650_s7 }
  0x63   : > { %s2811_s1 = scalar_lea.vmem %s651_s7, 16  ;;  %s3201_s19 = smov [#allocation16]  }
  0x64   : > { %p2812_p11 = scmp.ne.s32.totalorder %s651_s7, %s2811_s1  ;;  %s2816_s0 = sshll.u32 %s3201_s19, 4  ;;  %s2817_s0 = int_to_ptr.vmem [resolvable:$false] %s2816_s0 }
  0x65   : > { %s2818_s4 = scalar_lea.vmem %s2817_s0, 32  ;;  %p2819_p1 = scmp.lt.s32.totalorder %s651_s7, %s2817_s0 }
  0x66   : > { %p2814_p12 = pnand %p2812_p11, %p3382_p5  ;;  %p2820_p6 = scmp.lt.s32.totalorder %s2818_s4, %s2811_s1 }
  0x67   : > { %s648_s9 = scalar_lea.hbm %s4176_s8, %s3426_s12 }
  0x68   : > { %p2815_p13 = pneg %p2814_p12  ;;  %p2821_p7 = por %p2820_p6, %p2819_p1 }
  0x6a   : > { %p2822_p8 = pnand %p2821_p7, %p2815_p13 }
  0x6c   : > { %2825 = shalt.err (!%p2822_p8)
}
  0x6d   : > { %2587 = dma.hbm_to_vmem [thread:$0]  (!%p3375_p4), %s648_s9, 16, %s651_s7, %s4125_s24  }
  0x6e   : > { %s4177_s15 = sshll.u32 %s3184_s26, 12  ;;  %s4178_s11 = sld [smem:[#allocation61_spill]] }
  0x6f   : > { %s4179_s6 = sshll.u32 %s3360_s30, 8  ;;  %s4123_s4 = scalar_lea.sflag [#allocation20], %s3357_s29 }
  0x70   : > { %s688_s0 = scalar_lea.vmem [#allocation19], %s4179_s6  ;;  %s3202_s3 = smov [#allocation19]  }
  0x71   : > { %s695_s1 = sshll.u32 %s688_s0, 4  ;;  %s2844_s18 = sshll.u32 %s3202_s3, 4  ;;  %s696_s1 = int_to_ptr.vmem [resolvable:$true] %s695_s1  ;;  %s2845_s18 = int_to_ptr.vmem [resolvable:$false] %s2844_s18 }
  0x72   : > { %s2839_s2 = scalar_lea.vmem %s696_s1, 4096  ;;  %s2846_s14 = scalar_lea.vmem %s2845_s18, 8192 }
  0x73   : > { %p2840_p9 = scmp.ne.s32.totalorder %s696_s1, %s2839_s2  ;;  %p2847_p12 = scmp.lt.s32.totalorder %s696_s1, %s2845_s18 }
  0x74   : > { %s694_s19 = scalar_lea.hbm %s4178_s11, %s4177_s15  ;;  %p2848_p13 = scmp.lt.s32.totalorder %s2846_s14, %s2839_s2 }
  0x75   : > { %p2842_p10 = pnand %p2840_p9, %p3382_p5 }
  0x76   : > { %p2849_p1 = por %p2848_p13, %p2847_p12 }
  0x77   : > { %p2843_p11 = pneg %p2842_p10 }
  0x79   : > { %p2850_p6 = pnand %p2849_p1, %p2843_p11 }
  0x7b   : > { %2853 = shalt.err (!%p2850_p6)
}
  0x7c   : > { %s4180_s9 = smov 16   ;;  %s4181_s7 = smov 256  }
  0x7d   : > { %2593 = dma.hbm_to_vmem [thread:$0]  (!%p3375_p4), %s694_s19, 4096, %s696_s1, %s4123_s4, %s4181_s7, %s4181_s7, %s4180_s9  }
  0x7e   : > { %s3468_s3 = sadd.s32 4294967295, %s3192_s28   ;;  %s2258_s18 = sadd.s32 4294967294, %s3192_s28  }
  0x7f   : > { %s59_s14 = sadd.s32 1, %s3184_s26  ;;  %s4182_s15 = sld [smem:[#allocation33_spill]] }
  0x80   : > { %s4183_s25 = sld [smem:[#allocation34_spill]]  ;;  %s62_s16 = sadd.s32 1, %s3188_s27 }
  0x81   : > { %p60_p7 = scmp.ge.s32.totalorder %s59_s14, 3  ;;  %s69_s6 = sadd.s32 1, %s3172_s23 }
  0x82   : > { %p76_p8 = scmp.ne.s32.totalorder %s3172_s23, %s3168_s22  ;;  %p4126_p9 = scmp.ne.s32.totalorder %s3168_s22, %s3164_s21 }
  0x83   : > { %s4242_s14 = smov (%p60_p7, %s59_s14), 0  ;;  %s4244_s16 = smov (!%p60_p7, %s62_s16), %s3188_s27 }
  0x84   : > { %4184 = sst [smem:[#allocation46_spill]] %s4242_s14  ;;  %p3486_p10 = por %p77_p0, %p76_p8 }
  0x85   : > { %p83_p11 = scmp.eq.s32.totalorder %s3468_s3, 0  ;;  %p64_p12 = scmp.ge.s32.totalorder %s4244_s16, 2 }
  0x86   : > { %s92_s0 = ssub.s32 %s3184_s26, %s4242_s14  ;;  %s95_s2 = sadd.s32 1, %s3160_s20 }
  0x87   : > { %p3496_p13 = por %p83_p11, %p4126_p9  ;;  %p93_p1 = scmp.eq.s32.totalorder %s92_s0, 0 }
  0x88   : > { %s4246_s16 = smov (%p64_p12, %s4244_s16), 0  ;;  %p108_p0 = scmp.ne.s32.totalorder %s4183_s25, %s4182_s15 }
  0x89   : > { %s4186_s1 = scalar_select %p3496_p13, 1, 0 }
  0x8a   : > { %4187 = sst [smem:[#allocation47_spill]] %s4246_s16  ;;  %s66_s4 = ssub.s32 %s3188_s27, %s4246_s16 }
  0x8b   : > { %p444_p6 = scmp.eq.s32.totalorder %s3468_s3, 5  ;;  %p67_p7 = scmp.eq.s32.totalorder %s66_s4, 0 }
  0x8c   : > { %p3508_p2 = por %p108_p0, %p83_p11  ;;  %p450_p12 = scmp.eq.s32.totalorder %s2258_s18, 5 }
  0x8d   : > { %s3513_s5 = scalar_select %p93_p1, %s3160_s20, %s95_s2  }
  0x8e   : > { %s3516_s8 = scalar_select %p67_p7, %s3172_s23, %s69_s6  }
  0x8f   : > { %4189 = sst [smem:[#allocation48_spill]] %s3513_s5  ;;  %p3521_p9 = por %p444_p6, %p76_p8 }
  0x90   : > { %4190 = sst [smem:[#allocation49_spill]] %s3516_s8  ;;  %s496_s11 = sand.u32 1, %s3172_s23  }
  0x91   : > { %s2320_s14 = sshll.u32 %s3188_s27, 8  ;;  %p4192_p13 = scmp.ne.s32.totalorder %s3168_s22, %s3164_s21 }
  0x92   : > { %s2261_s4 = sshll.u32 %s496_s11, 4  ;;  %s4195_s2 = sld [smem:[#allocation50_spill]] }
  0x93   : > { %p3530_p3 = por %p450_p12, %p4192_p13  ;;  %p4196_p11 = scmp.lt.s32.totalorder %s3192_s28, 6 }
  0x94   : > { %s500_s18 = scalar_lea.vmem [#allocation4], %s2261_s4  ;;  %s497_s27 = scalar_lea.sflag [#allocation5], %s496_s11 }
  0x95   : > { %s4193_s15 = scalar_select %p3530_p3, 1, 0 }
  0x96   : > { %p3541_p1 = pnand %p4196_p11, %p3486_p10  ;;  %s508_s8 = sshll.u32 %s500_s18, 4  ;;  %s509_s8 = int_to_ptr.vmem [resolvable:$true] %s508_s8 }
  0x97   : > { %4194 = sst [smem:[#allocation33_spill]] %s4193_s15  ;;  %s2867_s23 = scalar_lea.vmem %s509_s8, 256 }
  0x98   : > { %s506_s5 = scalar_lea.hbm %s4195_s2, %s2320_s14  ;;  %p2856_p8 = pneg %p3541_p1 }
  0x99   : > { %p2868_p13 = scmp.ne.s32.totalorder %s509_s8, %s2867_s23  ;;  %s3203_s20 = smov [#allocation4]  }
  0x9a   : > { %s2872_s16 = sshll.u32 %s3203_s20, 4  ;;  %s2873_s16 = int_to_ptr.vmem [resolvable:$false] %s2872_s16 }
  0x9b   : > { %p2870_p0 = pnand %p2868_p13, %p2856_p8  ;;  %s2874_s14 = scalar_lea.vmem %s2873_s16, 512 }
  0x9c   : > { %p2875_p7 = scmp.lt.s32.totalorder %s509_s8, %s2873_s16  ;;  %p2876_p10 = scmp.lt.s32.totalorder %s2874_s14, %s2867_s23 }
  0x9d   : > { %p2871_p6 = pneg %p2870_p0 }
  0x9e   : > { %p2877_p12 = por %p2876_p10, %p2875_p7 }
  0xa0   : > { %p2878_p11 = pnand %p2877_p12, %p2871_p6 }
  0xa2   : > { %2881 = shalt.err (!%p2878_p11)
}
  0xa3   : > { %2566 = dma.hbm_to_vmem [thread:$0]  (!%p3541_p1), %s506_s5, 256, %s509_s8, %s497_s27  }
  0xa4   : > { %s4198_s4 = sld [smem:[#allocation52_spill]]  ;;  %s539_s2 = scalar_lea.vmem [#allocation9], %s3360_s30 }
  0xa5   : > { %s546_s18 = sshll.u32 %s539_s2, 4  ;;  %s3204_s23 = smov [#allocation9]   ;;  %s547_s18 = int_to_ptr.vmem [resolvable:$true] %s546_s18 }
  0xa6   : > { %s2895_s20 = scalar_lea.vmem %s547_s18, 16  ;;  %s2900_s16 = sshll.u32 %s3204_s23, 4  ;;  %s2901_s16 = int_to_ptr.vmem [resolvable:$false] %s2900_s16 }
  0xa7   : > { %p2896_p8 = scmp.ne.s32.totalorder %s547_s18, %s2895_s20  ;;  %s2902_s6 = scalar_lea.vmem %s2901_s16, 32 }
  0xa8   : > { %p2903_p6 = scmp.lt.s32.totalorder %s547_s18, %s2901_s16  ;;  %p2904_p7 = scmp.lt.s32.totalorder %s2902_s6, %s2895_s20 }
  0xa9   : > { %p2898_p13 = pnand %p2896_p8, %p3382_p5 }
  0xaa   : > { %s544_s25 = scalar_lea.hbm %s4198_s4, %s3426_s12  ;;  %p2905_p10 = por %p2904_p7, %p2903_p6 }
  0xab   : > { %p2899_p0 = pneg %p2898_p13 }
  0xad   : > { %p2906_p1 = pnand %p2905_p10, %p2899_p0 }
  0xaf   : > { %2909 = shalt.err (!%p2906_p1)
}
  0xb0   : > { %s4199_s5 = scalar_lea.sflag [#allocation8], %s3357_s29  ;;  %s4200_s14 = sld [smem:[#allocation54_spill]] }
  0xb1   : > { %2572 = dma.hbm_to_vmem [thread:$0]  (!%p3375_p4), %s544_s25, 16, %s547_s18, %s4199_s5  }
  0xb2   : > { %s577_s19 = scalar_lea.vmem [#allocation12], %s3360_s30  ;;  %s3205_s20 = smov [#allocation12]  }
  0xb3   : > { %s584_s4 = sshll.u32 %s577_s19, 4  ;;  %s2928_s23 = sshll.u32 %s3205_s20, 4  ;;  %s585_s4 = int_to_ptr.vmem [resolvable:$true] %s584_s4  ;;  %s2929_s23 = int_to_ptr.vmem [resolvable:$false] %s2928_s23 }
  0xb4   : > { %s2923_s2 = scalar_lea.vmem %s585_s4, 16  ;;  %s2930_s16 = scalar_lea.vmem %s2929_s23, 32 }
  0xb5   : > { %p2924_p12 = scmp.ne.s32.totalorder %s585_s4, %s2923_s2  ;;  %p2931_p13 = scmp.lt.s32.totalorder %s585_s4, %s2929_s23 }
  0xb6   : > { %s582_s11 = scalar_lea.hbm %s4200_s14, %s3426_s12  ;;  %p2932_p0 = scmp.lt.s32.totalorder %s2930_s16, %s2923_s2 }
  0xb7   : > { %p2926_p11 = pnand %p2924_p12, %p3382_p5 }
  0xb8   : > { %p2933_p6 = por %p2932_p0, %p2931_p13 }
  0xb9   : > { %p2927_p8 = pneg %p2926_p11 }
  0xbb   : > { %p2934_p7 = pnand %p2933_p6, %p2927_p8 }
  0xbd   : > { %2937 = shalt.err (!%p2934_p7)
}
  0xbe   : > { %s4201_s12 = scalar_lea.sflag [#allocation11], %s3357_s29  ;;  %s4202_s25 = sld [smem:[#allocation44_spill]] }
  0xbf   : > { %2578 = dma.hbm_to_vmem [thread:$0]  (!%p3375_p4), %s582_s11, 16, %s585_s4, %s4201_s12  }
  0xc0   : > { %s4203_s5 = sld [smem:[#allocation57_spill]]  ;;  %s3206_s2 = smov [#allocation15]  }
  0xc1   : > { %s2956_s20 = sshll.u32 %s3206_s2, 4  ;;  %s2957_s20 = int_to_ptr.vmem [resolvable:$false] %s2956_s20 }
  0xc2   : > { %s2958_s23 = scalar_lea.vmem %s2957_s20, 4096 }
  0xc4   : > { %s623_s27 = scalar_lea.vmem [#allocation15], %s4202_s25 }
  0xc5   : > { %s630_s14 = sshll.u32 %s623_s27, 4  ;;  %s631_s14 = int_to_ptr.vmem [resolvable:$true] %s630_s14 }
  0xc6   : > { %s629_s8 = scalar_lea.hbm %s4203_s5, %s3366_s17  ;;  %s2951_s19 = scalar_lea.vmem %s631_s14, 2048 }
  0xc7   : > { %p2952_p10 = scmp.ne.s32.totalorder %s631_s14, %s2951_s19  ;;  %p2959_p11 = scmp.lt.s32.totalorder %s631_s14, %s2957_s20 }
  0xc8   : > { %p2960_p8 = scmp.lt.s32.totalorder %s2958_s23, %s2951_s19 }
  0xc9   : > { %p2954_p1 = pnand %p2952_p10, %p3382_p5 }
  0xca   : > { %p2961_p13 = por %p2960_p8, %p2959_p11 }
  0xcb   : > { %p2955_p12 = pneg %p2954_p1 }
  0xcd   : > { %p2962_p0 = pnand %p2961_p13, %p2955_p12 }
  0xcf   : > { %2965 = shalt.err (!%p2962_p0)
}
  0xd0   : > { %s4204_s11 = smov 8   ;;  %s4205_s4 = smov 128  }
  0xd1   : > { %s4206_s16 = scalar_lea.sflag [#allocation14], %s3357_s29  ;;  %s4207_s6 = sld [smem:[#allocation59_spill]] }
  0xd2   : > { %2584 = dma.hbm_to_vmem [thread:$0]  (!%p3375_p4), %s629_s8, 2048, %s631_s14, %s4206_s16, %s4205_s4, %s4205_s4, %s4204_s11  }
  0xd3   : > { %s661_s27 = scalar_lea.vmem [#allocation18], %s4202_s25  ;;  %s2285_s2 = sshll.u32 %s3360_s30, 9 }
  0xd4   : > { %s668_s19 = sshll.u32 %s661_s27, 4  ;;  %s3207_s23 = smov [#allocation18]   ;;  %s669_s19 = int_to_ptr.vmem [resolvable:$true] %s668_s19 }
  0xd5   : > { %s2979_s20 = scalar_lea.vmem %s669_s19, 2048  ;;  %s2984_s15 = sshll.u32 %s3207_s23, 4  ;;  %s2985_s15 = int_to_ptr.vmem [resolvable:$false] %s2984_s15 }
  0xd6   : > { %p2980_p6 = scmp.ne.s32.totalorder %s669_s19, %s2979_s20  ;;  %s2986_s21 = scalar_lea.vmem %s2985_s15, 4096 }
  0xd7   : > { %s667_s5 = scalar_lea.hbm %s4207_s6, %s3366_s17  ;;  %p2987_p1 = scmp.lt.s32.totalorder %s669_s19, %s2985_s15 }
  0xd8   : > { %p2982_p7 = pnand %p2980_p6, %p3382_p5  ;;  %p2988_p12 = scmp.lt.s32.totalorder %s2986_s21, %s2979_s20 }
  0xda   : > { %p2983_p10 = pneg %p2982_p7  ;;  %p2989_p11 = por %p2988_p12, %p2987_p1 }
  0xdc   : > { %p2990_p8 = pnand %p2989_p11, %p2983_p10 }
  0xde   : > { %2993 = shalt.err (!%p2990_p8)
}
  0xdf   : > { %s4208_s30 = scalar_lea.sflag [#allocation17], %s3357_s29  ;;  %s2327_s17 = sshll.u32 %s3184_s26, 13 }
  0xe0   : > { %2590 = dma.hbm_to_vmem [thread:$0]  (!%p3375_p4), %s667_s5, 2048, %s669_s19, %s4208_s30, %s4205_s4, %s4205_s4, %s4204_s11  }
  0xe1   : > { %s4209_s14 = sld [smem:[#allocation63_spill]]  ;;  %s716_s15 = scalar_lea.vmem [#allocation21], %s2285_s2 }
  0xe2   : > { %s723_s21 = sshll.u32 %s716_s15, 4  ;;  %s3208_s18 = smov [#allocation21]   ;;  %s724_s21 = int_to_ptr.vmem [resolvable:$true] %s723_s21 }
  0xe3   : > { %s3007_s12 = scalar_lea.vmem %s724_s21, 8192  ;;  %s3012_s6 = sshll.u32 %s3208_s18, 4  ;;  %s3013_s6 = int_to_ptr.vmem [resolvable:$false] %s3012_s6 }
  0xe4   : > { %p3008_p13 = scmp.ne.s32.totalorder %s724_s21, %s3007_s12  ;;  %s3014_s27 = scalar_lea.vmem %s3013_s6, 16384 }
  0xe5   : > { %p3015_p7 = scmp.lt.s32.totalorder %s724_s21, %s3013_s6  ;;  %p3016_p10 = scmp.lt.s32.totalorder %s3014_s27, %s3007_s12 }
  0xe6   : > { %p3010_p0 = pnand %p3008_p13, %p3382_p5 }
  0xe7   : > { %s722_s16 = scalar_lea.hbm %s4209_s14, %s2327_s17  ;;  %p3017_p1 = por %p3016_p10, %p3015_p7 }
  0xe8   : > { %p3011_p6 = pneg %p3010_p0 }
  0xea   : > { %p3018_p12 = pnand %p3017_p1, %p3011_p6 }
  0xec   : > { %3021 = shalt.err (!%p3018_p12)
}
  0xed   : > { %s4210_s11 = scalar_lea.sflag [#allocation20], %s3357_s29  ;;  %s4211_s13 = sld [smem:[#allocation45_spill]] }
  0xee   : > { %2596 = dma.hbm_to_vmem [thread:$0]  (!%p3375_p4), %s722_s16, 8192, %s724_s21, %s4210_s11, %s4181_s7, %s4181_s7, %s4180_s9  }
  0xf3   : > { %p4212_p5 = scmp.ne.s32.totalorder %s4211_s13, 0 }
  0xf4   : > { %s3616_s4 = sand.u32 (!%p4212_p5), 1, %s3168_s22   ;;  %p4213_p11 = scmp.ne.s32.totalorder (!%p4212_p5), %s4186_s1, 0 }
  0xf5   : > { %735 = sbr.rel (%p4212_p5) target bundleno = 2035 (0x7f3), region = 76  ;;  %s4135_s5 = sshll.u32 (!%p4212_p5), %s3616_s4, 4 }
  0xf6   : > { %s738_s19 = scalar_lea.sflag (!%p4212_p5), [#allocation5], %s3616_s4  ;;  %s3622_s10 = scalar_lea.vmem (!%p4212_p5), [#allocation4], %s4135_s5 }
  0xfa   : > { %3119 = dma.done.wait (%p4213_p11), %s738_s19, 256  }
  0xfb   : > { %3121 = vsyncadd (%p4213_p11), %s738_s19, 4294967040  ;;  %s4214_s29 = sld [smem:[#allocation34_spill]]  ;;  %s746_s9 = sand.u32 1, %s3468_s3  }
  0xfc   : > { %s747_s20 = scalar_lea.sflag [#allocation8], %s746_s9 }
 0x101   : > { %s3630_s7 = sand.u32 1, %s4214_s29  }
 0x102   : > { %s2290_s2 = sshll.u32 %s3630_s7, 7 }
 0x103   : > { %s3633_s23 = scalar_lea.vmem [#allocation7], %s2290_s2 }
 0x104   : > { %3123 = dma.done.wait (%p3508_p2), %s747_s20, 2064  }
 0x105   : > { %3125 = vsyncadd (%p3508_p2), %s747_s20, 4294965232  ;;  %s764_s30 = scalar_lea.sflag [#allocation11], %s746_s9  ;;  %s3640_s17 = scalar_lea.vmem [#allocation10], %s2290_s2 }
 0x106   : > { %3127 = dma.done.wait (%p3508_p2), %s764_s30, 2064  }
 0x107   : > { %3129 = vsyncadd (%p3508_p2), %s764_s30, 4294965232  ;;  %s2292_s3 = sshll.u32 %s3630_s7, 8  ;;  %s781_s8 = scalar_lea.sflag [#allocation14], %s746_s9 }
 0x108   : > { %s3648_s14 = scalar_lea.vmem [#allocation13], %s2292_s3 }
 0x109   : > { %3131 = dma.done.wait (%p3508_p2), %s781_s8, 6144  }
 0x10a   : > { %3133 = vsyncadd (%p3508_p2), %s781_s8, 4294961152  ;;  %s3654_s16 = scalar_lea.vmem [#allocation15], %s2290_s2  ;;  %s799_s15 = scalar_lea.sflag [#allocation17], %s746_s9 }
 0x10b   : > { %3135 = dma.done.wait (%p3508_p2), %s799_s15, 2064  }
 0x10c   : > { %3137 = vsyncadd (%p3508_p2), %s799_s15, 4294965232  ;;  %s3661_s12 = scalar_lea.vmem [#allocation18], %s2290_s2  ;;  %s816_s18 = scalar_lea.sflag [#allocation20], %s746_s9 }
 0x10d   : > { %s3663_s6 = scalar_lea.vmem [#allocation19], %s2292_s3 }
 0x10e   : > { %3139 = dma.done.wait (%p3508_p2), %s816_s18, 12288  }
 0x10f   : > { %3141 = vsyncadd (%p3508_p2), %s816_s18, 4294955008  ;;  %s4215_s27 = sld [smem:[#allocation39_spill]]  ;;  %s2296_s11 = sshll.u32 %s3630_s7, 9 }
 0x110   : > { %s2298_s13 = sshll.u32 %s3616_s4, 3  ;;  %s4216_s20 = sld [smem:[#allocation60_spill]] }
 0x111   : > { %s4217_s8 = sld [smem:[#allocation56_spill]]  ;;  %s3690_s5 = scalar_lea.vmem [#allocation21], %s2296_s11 }
 0x112   : > { %s4218_s25 = sld [smem:[#allocation62_spill]]  ;;  %s4219_s26 = sshll.u32 %s3616_s4, 4 }
 0x113   : > { %s3694_s22 = scalar_lea.vmem [#allocation22], %s4219_s26  ;;  %s3696_s28 = scalar_lea.vmem [#allocation23], %s2298_s13 }
 0x115   : > { %p938_p4 = scmp.lt.s32.totalorder %s4215_s27, 2  ;;  %p2301_p2 = scmp.ne.s32.totalorder %s4215_s27, 0 }
 0x117   : > { %s3673_s19 = scalar_select %p938_p4, %s4215_s27, 2 }
 0x118   : > { %952 = sbr.rel (%p2301_p2) target bundleno = 288 (0x120), region = 124 }
 0x119   : > { %s2299_s29 = sshll.u32 %s3673_s19, 1  ;;  %s944_s30 = scalar_lea.vmem %s4216_s20, %s3673_s19 }
 0x11a   : > { %s3683_s15 = scalar_lea.vmem %s4217_s8, %s2299_s29  ;;  %s3688_s1 = scalar_lea.vmem %s4218_s25, %s2299_s29 }
 0x11d   : > { %v953_v0 = vld [vmem:[%s3622_s10] sm:$0xff]  ;;  %v954_v1 = vld [vmem:[%s3622_s10 + $0x8] sm:$0xff]  ;;  %v3209_v2 = vmov 0.0  }
 0x11e   : > { %955 = vst [vmem:[#allocation2] sm:$0xff] %v953_v0  ;;  %956 = vst [vmem:[#allocation2 + $0x8] sm:$0xff] %v954_v1 }
 0x11f   : > { %957 = vst [vmem:[#allocation3] sm:$0xff] %v3209_v2 }
 0x120 PF: > { %v975_v3 = vld [vmem:[%s3633_s23 + $0x78] sm:$0xff]  ;;  %v3210_v4 = vmov 0.0   ;;  %v974_v5 = vld [vmem:[%s3633_s23 + $0x70] sm:$0xff]  ;;  %vm3211_vm0 = vmmov 0   ;;  %v973_v6 = vld [vmem:[%s3633_s23 + $0x68] sm:$0xff]  ;;  %s4220_s26 = scalar_lea.vmem [#allocation9], %s3630_s7 }
 0x121   : > { %2397 = vmatprep.subr.mxu0 %v3210_v4  ;;  %2429 = vmatprep.mubr.msk.f32.mxu0 %vm3211_vm0, %v3210_v4  ;;  %v972_v7 = vld [vmem:[%s3633_s23 + $0x60] sm:$0xff]  ;;  %v1068_v9 = vld [vmem:[%s3640_s17 + $0x70] sm:$0xff]  ;;  %v1067_v11 = vld [vmem:[%s3640_s17 + $0x68] sm:$0xff]  ;;  %s4221_s10 = scalar_lea.vmem [#allocation12], %s3630_s7 }
 0x122   : > { %2398 = vmatpush3.msra.mxu0 %v975_v3  ;;  %2432 = vmatprep.subr.mxu1 %v3210_v4  ;;  %v1069_v8 = vld [vmem:[%s3640_s17 + $0x78] sm:$0xff]  ;;  %v970_v12 = vld [vmem:[%s3633_s23 + $0x50] sm:$0xff]  ;;  %v1066_v13 = vld [vmem:[%s3640_s17 + $0x60] sm:$0xff] }
 0x123   : > { %2399 = vmatprep.subr.mxu0 %v3210_v4  ;;  %2464 = vmatprep.mubr.msk.f32.mxu1 %vm3211_vm0, %v3210_v4  ;;  %v971_v10 = vld [vmem:[%s3633_s23 + $0x58] sm:$0xff]  ;;  %v969_v14 = vld [vmem:[%s3633_s23 + $0x48] sm:$0xff]  ;;  %v968_v16 = vld [vmem:[%s3633_s23 + $0x40] sm:$0xff] }
 0x124   : > { %2400 = vmatpush3.msra.mxu0 %v974_v5  ;;  %2433 = vmatpush3.msra.mxu1 %v1069_v8  ;;  %v1065_v15 = vld [vmem:[%s3640_s17 + $0x58] sm:$0xff]  ;;  %v1064_v17 = vld [vmem:[%s3640_s17 + $0x50] sm:$0xff]  ;;  %v1063_v19 = vld [vmem:[%s3640_s17 + $0x48] sm:$0xff] }
 0x125   : > { %2401 = vmatprep.subr.mxu0 %v3210_v4  ;;  %2434 = vmatprep.subr.mxu1 %v3210_v4  ;;  %v967_v18 = vld [vmem:[%s3633_s23 + $0x38] sm:$0xff]  ;;  %v966_v20 = vld [vmem:[%s3633_s23 + $0x30] sm:$0xff]  ;;  %v1062_v21 = vld [vmem:[%s3640_s17 + $0x40] sm:$0xff] }
 0x126   : > { %2402 = vmatpush3.msra.mxu0 %v973_v6  ;;  %2435 = vmatpush3.msra.mxu1 %v1068_v9  ;;  %v965_v22 = vld [vmem:[%s3633_s23 + $0x28] sm:$0xff]  ;;  %v1061_v23 = vld [vmem:[%s3640_s17 + $0x38] sm:$0xff]  ;;  %v1060_v25 = vld [vmem:[%s3640_s17 + $0x30] sm:$0xff] }
 0x127   : > { %2403 = vmatprep.subr.mxu0 %v3210_v4  ;;  %2436 = vmatprep.subr.mxu1 %v3210_v4  ;;  %v964_v24 = vld [vmem:[%s3633_s23 + $0x20] sm:$0xff]  ;;  %v963_v26 = vld [vmem:[%s3633_s23 + $0x18] sm:$0xff]  ;;  %v1059_v27 = vld [vmem:[%s3640_s17 + $0x28] sm:$0xff] }
 0x128   : > { %2404 = vmatpush3.msra.mxu0 %v972_v7  ;;  %2437 = vmatpush3.msra.mxu1 %v1067_v11  ;;  %v962_v28 = vld [vmem:[%s3633_s23 + $0x10] sm:$0xff]  ;;  %v1058_v29 = vld [vmem:[%s3640_s17 + $0x20] sm:$0xff]  ;;  %v1057_v31 = vld [vmem:[%s3640_s17 + $0x18] sm:$0xff] }
 0x129   : > { %2405 = vmatprep.subr.mxu0 %v3210_v4  ;;  %2438 = vmatprep.subr.mxu1 %v3210_v4  ;;  %v961_v30 = vld [vmem:[%s3633_s23 + $0x8] sm:$0xff]  ;;  %v960_v32 = vld [vmem:[%s3633_s23] sm:$0xff]  ;;  %v3762_v33 = vld [vmem:[#allocation2 + $0x8] sm:$0xff]  ;;  %s4222_s23 = scalar_lea.vmem [#allocation16], %s3630_s7 }
 0x12a   : > { %2406 = vmatpush3.msra.mxu0 %v971_v10  ;;  %2439 = vmatpush3.msra.mxu1 %v1066_v13  ;;  %v1056_v34 = vld [vmem:[%s3640_s17 + $0x10] sm:$0xff]  ;;  %v1055_v35 = vld [vmem:[%s3640_s17 + $0x8] sm:$0xff]  ;;  %v1054_v36 = vld [vmem:[%s3640_s17] sm:$0xff] }
 0x12b   : > { %2407 = vmatprep.subr.mxu0 %v3210_v4  ;;  %2440 = vmatprep.subr.mxu1 %v3210_v4  ;;  %v1179_v37 = vld [vmem:[%s3648_s14 + $0xf8] sm:$0xff]  ;;  %v1178_v38 = vld [vmem:[%s3648_s14 + $0xf0] sm:$0xff]  ;;  %v1177_v39 = vld [vmem:[%s3648_s14 + $0xe8] sm:$0xff] }
 0x12c   : > { %2408 = vmatpush3.msra.mxu0 %v970_v12  ;;  %2441 = vmatpush3.msra.mxu1 %v1065_v15  ;;  %v1176_v40 = vld [vmem:[%s3648_s14 + $0xe0] sm:$0xff]  ;;  %v1175_v41 = vld [vmem:[%s3648_s14 + $0xd8] sm:$0xff]  ;;  %v1174_v42 = vld [vmem:[%s3648_s14 + $0xd0] sm:$0xff] }
 0x12d   : > { %2409 = vmatprep.subr.mxu0 %v3210_v4  ;;  %2442 = vmatprep.subr.mxu1 %v3210_v4  ;;  %v1173_v43 = vld [vmem:[%s3648_s14 + $0xc8] sm:$0xff]  ;;  %v1172_v44 = vld [vmem:[%s3648_s14 + $0xc0] sm:$0xff]  ;;  %v1171_v45 = vld [vmem:[%s3648_s14 + $0xb8] sm:$0xff] }
 0x12e   : > { %2410 = vmatpush3.msra.mxu0 %v969_v14  ;;  %2443 = vmatpush3.msra.mxu1 %v1064_v17  ;;  %v1170_v46 = vld [vmem:[%s3648_s14 + $0xb0] sm:$0xff]  ;;  %v1169_v47 = vld [vmem:[%s3648_s14 + $0xa8] sm:$0xff]  ;;  %v1168_v48 = vld [vmem:[%s3648_s14 + $0xa0] sm:$0xff] }
 0x12f   : > { %2411 = vmatprep.subr.mxu0 %v3210_v4  ;;  %2444 = vmatprep.subr.mxu1 %v3210_v4  ;;  %v1167_v49 = vld [vmem:[%s3648_s14 + $0x98] sm:$0xff]  ;;  %v1166_v50 = vld [vmem:[%s3648_s14 + $0x90] sm:$0xff]  ;;  %v1165_v51 = vld [vmem:[%s3648_s14 + $0x88] sm:$0xff] }
 0x130   : > { %2412 = vmatpush3.msra.mxu0 %v968_v16  ;;  %2445 = vmatpush3.msra.mxu1 %v1063_v19  ;;  %v1164_v52 = vld [vmem:[%s3648_s14 + $0x80] sm:$0xff]  ;;  %v1163_v53 = vld [vmem:[%s3648_s14 + $0x78] sm:$0xff]  ;;  %v1162_v54 = vld [vmem:[%s3648_s14 + $0x70] sm:$0xff] }
 0x131   : > { %2413 = vmatprep.subr.mxu0 %v3210_v4  ;;  %2446 = vmatprep.subr.mxu1 %v3210_v4  ;;  %v1161_v55 = vld [vmem:[%s3648_s14 + $0x68] sm:$0xff]  ;;  %v1160_v56 = vld [vmem:[%s3648_s14 + $0x60] sm:$0xff]  ;;  %v1159_v57 = vld [vmem:[%s3648_s14 + $0x58] sm:$0xff] }
 0x132   : > { %2414 = vmatpush3.msra.mxu0 %v967_v18  ;;  %2447 = vmatpush3.msra.mxu1 %v1062_v21  ;;  %v1158_v58 = vld [vmem:[%s3648_s14 + $0x50] sm:$0xff]  ;;  %v1157_v59 = vld [vmem:[%s3648_s14 + $0x48] sm:$0xff]  ;;  %v1156_v60 = vld [vmem:[%s3648_s14 + $0x40] sm:$0xff] }
 0x133   : > { %2415 = vmatprep.subr.mxu0 %v3210_v4  ;;  %2448 = vmatprep.subr.mxu1 %v3210_v4  ;;  %v1155_v61 = vld [vmem:[%s3648_s14 + $0x38] sm:$0xff]  ;;  %v1154_v62 = vld [vmem:[%s3648_s14 + $0x30] sm:$0xff]  ;;  %v1153_v63 = vld [vmem:[%s3648_s14 + $0x28] sm:$0xff] }
 0x134   : > { %2416 = vmatpush3.msra.mxu0 %v966_v20  ;;  %2449 = vmatpush3.msra.mxu1 %v1061_v23  ;;  %v2302_v0 = vld [vmem:[%s4220_s26] ss:$0 sm:$0xff]  ;;  %v1151_v7 = vld [vmem:[%s3648_s14 + $0x18] sm:$0xff]  ;;  %v1150_v8 = vld [vmem:[%s3648_s14 + $0x10] sm:$0xff] }
 0x135   : > { %2417 = vmatprep.subr.mxu0 %v3210_v4  ;;  %2450 = vmatprep.subr.mxu1 %v3210_v4  ;;  %v1152_v6 = vld [vmem:[%s3648_s14 + $0x20] sm:$0xff]  ;;  %v1149_v9 = vld [vmem:[%s3648_s14 + $0x8] sm:$0xff]  ;;  %v1319_v16 = vld [vmem:[%s3654_s16 + $0x78] sm:$0xff] }
 0x136   : > { %2418 = vmatpush3.msra.mxu0 %v965_v22  ;;  %2451 = vmatpush3.msra.mxu1 %v1060_v25  ;;  %v1148_v10 = vld [vmem:[%s3648_s14] sm:$0xff]  ;;  %v1318_v17 = vld [vmem:[%s3654_s16 + $0x70] sm:$0xff]  ;;  %v1317_v18 = vld [vmem:[%s3654_s16 + $0x68] sm:$0xff] }
 0x137   : > { %2419 = vmatprep.subr.mxu0 %v3210_v4  ;;  %2452 = vmatprep.subr.mxu1 %v3210_v4  ;;  %v2303_v11 = vld [vmem:[%s4221_s10] ss:$0 sm:$0xff]  ;;  %v1315_v20 = vld [vmem:[%s3654_s16 + $0x58] sm:$0xff]  ;;  %v1314_v21 = vld [vmem:[%s3654_s16 + $0x50] sm:$0xff] }
 0x138   : > { %2420 = vmatpush3.msra.mxu0 %v964_v24  ;;  %2453 = vmatpush3.msra.mxu1 %v1059_v27  ;;  %v1316_v19 = vld [vmem:[%s3654_s16 + $0x60] sm:$0xff]  ;;  %v1313_v22 = vld [vmem:[%s3654_s16 + $0x48] sm:$0xff]  ;;  %v1311_v24 = vld [vmem:[%s3654_s16 + $0x38] sm:$0xff] }
 0x139   : > { %2421 = vmatprep.subr.mxu0 %v3210_v4  ;;  %2454 = vmatprep.subr.mxu1 %v3210_v4  ;;  %v1312_v23 = vld [vmem:[%s3654_s16 + $0x40] sm:$0xff]  ;;  %v1310_v25 = vld [vmem:[%s3654_s16 + $0x30] sm:$0xff] }
 0x13a   : > { %2422 = vmatpush3.msra.mxu0 %v963_v26  ;;  %2455 = vmatpush3.msra.mxu1 %v1058_v29  ;;  %v1309_v26 = vld [vmem:[%s3654_s16 + $0x28] sm:$0xff]  ;;  %v1308_v27 = vld [vmem:[%s3654_s16 + $0x20] sm:$0xff]  ;;  %v1306_v29 = vld [vmem:[%s3654_s16 + $0x10] sm:$0xff] }
 0x13b   : > { %2423 = vmatprep.subr.mxu0 %v3210_v4  ;;  %2456 = vmatprep.subr.mxu1 %v3210_v4 }
 0x13c   : > { %2424 = vmatpush3.msra.mxu0 %v962_v28  ;;  %2457 = vmatpush3.msra.mxu1 %v1057_v31  ;;  %v1307_v28 = vld [vmem:[%s3654_s16 + $0x18] sm:$0xff]  ;;  %v1304_v31 = vld [vmem:[%s3654_s16] sm:$0xff] }
 0x13d   : > { %2425 = vmatprep.subr.mxu0 %v3210_v4  ;;  %2458 = vmatprep.subr.mxu1 %v3210_v4 }
 0x13e   : > { %2426 = vmatpush3.msra.mxu0 %v961_v30  ;;  %2459 = vmatpush3.msra.mxu1 %v1056_v34  ;;  %v1305_v30 = vld [vmem:[%s3654_s16 + $0x8] sm:$0xff]  ;;  %v1412_v34 = vld [vmem:[%s3661_s12 + $0x70] sm:$0xff] }
 0x13f   : > { %2427 = vmatprep.subr.mxu0 %v3210_v4  ;;  %2460 = vmatprep.subr.mxu1 %v3210_v4 }
 0x140   : > { %2428 = vmatpush3.msra.mxu0 %v960_v32  ;;  %2461 = vmatpush3.msra.mxu1 %v1055_v35  ;;  %v1413_v32 = vld [vmem:[%s3661_s12 + $0x78] sm:$0xff]  ;;  %v1411_v35 = vld [vmem:[%s3661_s12 + $0x68] sm:$0xff] }
 0x141   : > { %2430 = vmatmul.mubr.f32.vlgmr.msra.gmra.mxu0 %v3762_v33  ;;  %2462 = vmatprep.subr.mxu1 %v3210_v4 }
 0x142   : > { %1256 = vmatprep.mubr.f32.mxu0 %v3210_v4  ;;  %2463 = vmatpush3.msra.mxu1 %v1054_v36  ;;  %v1410_v36 = vld [vmem:[%s3661_s12 + $0x60] sm:$0xff] }
 0x143   : > { %2467 = vmatprep.subr.mxu1 %v3210_v4  ;;  %1192 = vmatprep.subr.mxu0 %v1179_v37  ;;  %v1409_v37 = vld [vmem:[%s3661_s12 + $0x58] sm:$0xff] }
 0x144   : > { %1193 = vmatpush1.msra.mxu0 %v1178_v38  ;;  %v1408_v38 = vld [vmem:[%s3661_s12 + $0x50] sm:$0xff] }
 0x145   : > { %1194 = vmatprep.subr.mxu0 %v1177_v39  ;;  %v1407_v39 = vld [vmem:[%s3661_s12 + $0x48] sm:$0xff] }
 0x146   : > { %1195 = vmatpush1.msra.mxu0 %v1176_v40  ;;  %v1406_v40 = vld [vmem:[%s3661_s12 + $0x40] sm:$0xff] }
 0x147   : > { %1196 = vmatprep.subr.mxu0 %v1175_v41  ;;  %v1405_v41 = vld [vmem:[%s3661_s12 + $0x38] sm:$0xff] }
 0x148   : > { %1197 = vmatpush1.msra.mxu0 %v1174_v42  ;;  %v1404_v42 = vld [vmem:[%s3661_s12 + $0x30] sm:$0xff] }
 0x149   : > { %1198 = vmatprep.subr.mxu0 %v1173_v43  ;;  %v1403_v43 = vld [vmem:[%s3661_s12 + $0x28] sm:$0xff] }
 0x14a   : > { %1199 = vmatpush1.msra.mxu0 %v1172_v44  ;;  %v1402_v44 = vld [vmem:[%s3661_s12 + $0x20] sm:$0xff] }
 0x14b   : > { %1200 = vmatprep.subr.mxu0 %v1171_v45  ;;  %v1401_v45 = vld [vmem:[%s3661_s12 + $0x18] sm:$0xff] }
 0x14c   : > { %1201 = vmatpush1.msra.mxu0 %v1170_v46  ;;  %v1182_v46 = vlaneseq }
 0x14d   : > { %1202 = vmatprep.subr.mxu0 %v1169_v47 }
 0x14e   : > { %1203 = vmatpush1.msra.mxu0 %v1168_v48  ;;  %v3872_v47 = vshrl.u32 %v1182_v46, 7  ;;  %v1513_v46 = vld [vmem:[%s3663_s6 + $0xa8] sm:$0xff] }
 0x14f   : > { %1204 = vmatprep.subr.mxu0 %v1167_v49  ;;  %v1180_v49 = vld [vmem:[%s3683_s15] sm:$0x3] }
 0x150   : > { %1205 = vmatpush1.msra.mxu0 %v1166_v50  ;;  %v1184_v48 = vsub.s32 0, %v3872_v47 }
 0x151   : > { %1206 = vmatprep.subr.mxu0 %v1165_v51 }
 0x152   : > { %1207 = vmatpush1.msra.mxu0 %v1164_v52  ;;  %v1185_v50 = vrot.slane %v1180_v49, %v1184_v48 }
 0x153   : > { %1208 = vmatprep.subr.mxu0 %v1163_v53 }
 0x154   : > { %1209 = vmatpush1.msra.mxu0 %v1162_v54 }
 0x155   : > { %1210 = vmatprep.subr.mxu0 %v1161_v55 }
 0x156   : > { %1211 = vmatpush1.msra.mxu0 %v1160_v56 }
 0x157   : > { %1212 = vmatprep.subr.mxu0 %v1159_v57 }
 0x158   : > { %1213 = vmatpush1.msra.mxu0 %v1158_v58 }
 0x159   : > { %1214 = vmatprep.subr.mxu0 %v1157_v59 }
 0x15a   : > { %1215 = vmatpush1.msra.mxu0 %v1156_v60 }
 0x15b   : > { %1216 = vmatprep.subr.mxu0 %v1155_v61 }
 0x15c   : > { %1217 = vmatpush1.msra.mxu0 %v1154_v62 }
 0x15d   : > { %1218 = vmatprep.subr.mxu0 %v1153_v63 }
 0x15e   : > { %1219 = vmatpush1.msra.mxu0 %v1152_v6 }
 0x15f   : > { %1220 = vmatprep.subr.mxu0 %v1151_v7 }
 0x160   : > { %1221 = vmatpush1.msra.mxu0 %v1150_v8 }
 0x161   : > { %1222 = vmatprep.subr.mxu0 %v1149_v9 }
 0x162   : > { %1223 = vmatpush1.msra.mxu0 %v1148_v10 }
 0x163   : > { %2502 = vmatprep.subr.mxu0 %v3210_v4 }
 0x201   : > { %v1049_v1 = vpop.f32.mrf.mxu0 }
 0x202   : > { %v1050_v2 = vadd.f32 %v2302_v0, %v1049_v1 }
 0x203   : > { %v2431_v3 = vpop.f32.mrf.mxu0 }
 0x204   : > { %v1053_v5 = vmax.f32 %v1050_v2, 0.0 }
 0x206   : > { %2465 = vmatmul.mubr.f32.vlgmr.msra.gmra.mxu1 %v1053_v5 }
 0x207   : > { %2499 = vmatprep.mubr.msk.f32.mxu1 %vm3211_vm0, %v3210_v4  ;;  %2468 = vmatpush3.msra.mxu1 %v1319_v16 }
 0x208   : > { %2469 = vmatprep.subr.mxu1 %v3210_v4 }
 0x209   : > { %2470 = vmatpush3.msra.mxu1 %v1318_v17 }
 0x20a   : > { %2471 = vmatprep.subr.mxu1 %v3210_v4 }
 0x20b   : > { %2472 = vmatpush3.msra.mxu1 %v1317_v18 }
 0x20c   : > { %2473 = vmatprep.subr.mxu1 %v3210_v4 }
 0x20d   : > { %2474 = vmatpush3.msra.mxu1 %v1316_v19  ;;  %v3212_v19 = vmov 1.0  }
 0x20e   : > { %2475 = vmatprep.subr.mxu1 %v3210_v4 }
 0x20f   : > { %2476 = vmatpush3.msra.mxu1 %v1315_v20 }
 0x210   : > { %2477 = vmatprep.subr.mxu1 %v3210_v4 }
 0x211   : > { %2478 = vmatpush3.msra.mxu1 %v1314_v21 }
 0x212   : > { %2479 = vmatprep.subr.mxu1 %v3210_v4 }
 0x213   : > { %2480 = vmatpush3.msra.mxu1 %v1313_v22 }
 0x214   : > { %2481 = vmatprep.subr.mxu1 %v3210_v4 }
 0x215   : > { %2482 = vmatpush3.msra.mxu1 %v1312_v23 }
 0x216   : > { %2483 = vmatprep.subr.mxu1 %v3210_v4 }
 0x217   : > { %2484 = vmatpush3.msra.mxu1 %v1311_v24  ;;  %v1188_v24 = vsub.s32 1, %v3872_v47 }
 0x218   : > { %2485 = vmatprep.subr.mxu1 %v3210_v4 }
 0x219   : > { %2486 = vmatpush3.msra.mxu1 %v1310_v25  ;;  %v1189_v25 = vrot.slane %v1180_v49, %v1188_v24  ;;  %v1512_v49 = vld [vmem:[%s3663_s6 + $0xa0] sm:$0xff] }
 0x21a   : > { %2487 = vmatprep.subr.mxu1 %v3210_v4 }
 0x21b   : > { %2488 = vmatpush3.msra.mxu1 %v1309_v26  ;;  %v958_v26 = vld [vmem:[#allocation2] sm:$0xff] }
 0x21c   : > { %2489 = vmatprep.subr.mxu1 %v3210_v4 }
 0x21d   : > { %2490 = vmatpush3.msra.mxu1 %v1308_v27 }
 0x21e   : > { %2491 = vmatprep.subr.mxu1 %v3210_v4 }
 0x21f   : > { %2492 = vmatpush3.msra.mxu1 %v1307_v28 }
 0x220   : > { %2493 = vmatprep.subr.mxu1 %v3210_v4 }
 0x221   : > { %2494 = vmatpush3.msra.mxu1 %v1306_v29 }
 0x222   : > { %2495 = vmatprep.subr.mxu1 %v3210_v4 }
 0x223   : > { %2496 = vmatpush3.msra.mxu1 %v1305_v30 }
 0x224   : > { %2497 = vmatprep.subr.mxu1 %v3210_v4 }
 0x225   : > { %2498 = vmatpush3.msra.mxu1 %v1304_v31 }
 0x2c6   : > { %v1143_v12 = vpop.f32.mrf.mxu1 }
 0x2c7   : > { %v1144_v13 = vadd.f32 %v2303_v11, %v1143_v12 }
 0x2c8   : > { %v2466_v14 = vpop.f32.mrf.mxu1 }
 0x2c9   : > { %v1147_v15 = vmax.f32 %v1144_v13, 0.0 }
 0x2cb   : > { %1257 = vmatmul.mubr.f32.vlgmr.msra.gmra.mxu0 %v1147_v15 }
 0x2cc   : > { %2534 = vmatprep.mubr.msk.f32.mxu0 %vm3211_vm0, %v3210_v4  ;;  %2503 = vmatpush3.msra.mxu0 %v1413_v32  ;;  %v1400_v32 = vld [vmem:[%s3661_s12 + $0x10] sm:$0xff] }
 0x2cd   : > { %2504 = vmatprep.subr.mxu0 %v3210_v4 }
 0x2ce   : > { %2505 = vmatpush3.msra.mxu0 %v1412_v34  ;;  %v1399_v34 = vld [vmem:[%s3661_s12 + $0x8] sm:$0xff] }
 0x2cf   : > { %2506 = vmatprep.subr.mxu0 %v3210_v4 }
 0x2d0   : > { %2507 = vmatpush3.msra.mxu0 %v1411_v35  ;;  %v1398_v35 = vld [vmem:[%s3661_s12] sm:$0xff] }
 0x2d1   : > { %2508 = vmatprep.subr.mxu0 %v3210_v4 }
 0x2d2   : > { %2509 = vmatpush3.msra.mxu0 %v1410_v36  ;;  %v1523_v36 = vld [vmem:[%s3663_s6 + $0xf8] sm:$0xff] }
 0x2d3   : > { %2510 = vmatprep.subr.mxu0 %v3210_v4  ;;  %1536 = vmatprep.subr.mxu1 %v1523_v36  ;;  %v1669_v36 = vld [vmem:[%s3690_s5 + $0x88] sm:$0xff] }
 0x2d4   : > { %2511 = vmatpush3.msra.mxu0 %v1409_v37  ;;  %v1522_v37 = vld [vmem:[%s3663_s6 + $0xf0] sm:$0xff] }
 0x2d5   : > { %2512 = vmatprep.subr.mxu0 %v3210_v4 }
 0x2d6   : > { %2513 = vmatpush3.msra.mxu0 %v1408_v38  ;;  %v1521_v38 = vld [vmem:[%s3663_s6 + $0xe8] sm:$0xff] }
 0x2d7   : > { %2514 = vmatprep.subr.mxu0 %v3210_v4 }
 0x2d8   : > { %2515 = vmatpush3.msra.mxu0 %v1407_v39  ;;  %v1520_v39 = vld [vmem:[%s3663_s6 + $0xe0] sm:$0xff] }
 0x2d9   : > { %2516 = vmatprep.subr.mxu0 %v3210_v4 }
 0x2da   : > { %2517 = vmatpush3.msra.mxu0 %v1406_v40  ;;  %v1519_v40 = vld [vmem:[%s3663_s6 + $0xd8] sm:$0xff] }
 0x2db   : > { %2518 = vmatprep.subr.mxu0 %v3210_v4 }
 0x2dc   : > { %2519 = vmatpush3.msra.mxu0 %v1405_v41  ;;  %v1518_v41 = vld [vmem:[%s3663_s6 + $0xd0] sm:$0xff] }
 0x2dd   : > { %2520 = vmatprep.subr.mxu0 %v3210_v4 }
 0x2de   : > { %2521 = vmatpush3.msra.mxu0 %v1404_v42  ;;  %v1517_v42 = vld [vmem:[%s3663_s6 + $0xc8] sm:$0xff] }
 0x2df   : > { %2522 = vmatprep.subr.mxu0 %v3210_v4 }
 0x2e0   : > { %2523 = vmatpush3.msra.mxu0 %v1403_v43  ;;  %v1516_v43 = vld [vmem:[%s3663_s6 + $0xc0] sm:$0xff] }
 0x2e1   : > { %2524 = vmatprep.subr.mxu0 %v3210_v4 }
 0x2e2   : > { %2525 = vmatpush3.msra.mxu0 %v1402_v44  ;;  %v1515_v44 = vld [vmem:[%s3663_s6 + $0xb8] sm:$0xff] }
 0x2e3   : > { %2526 = vmatprep.subr.mxu0 %v3210_v4 }
 0x2e4   : > { %2527 = vmatpush3.msra.mxu0 %v1401_v45  ;;  %v1514_v45 = vld [vmem:[%s3663_s6 + $0xb0] sm:$0xff] }
 0x2e5   : > { %2528 = vmatprep.subr.mxu0 %v3210_v4 }
 0x2e6   : > { %2529 = vmatpush3.msra.mxu0 %v1400_v32  ;;  %v1672_v32 = vld [vmem:[%s3690_s5 + $0xa0] sm:$0xff] }
 0x2e7   : > { %2530 = vmatprep.subr.mxu0 %v3210_v4 }
 0x2e8   : > { %2531 = vmatpush3.msra.mxu0 %v1399_v34  ;;  %v1671_v34 = vld [vmem:[%s3690_s5 + $0x98] sm:$0xff] }
 0x2e9   : > { %2532 = vmatprep.subr.mxu0 %v3210_v4 }
 0x2ea   : > { %2533 = vmatpush3.msra.mxu0 %v1398_v35  ;;  %v1670_v35 = vld [vmem:[%s3690_s5 + $0x90] sm:$0xff] }
 0x38b   : > { %v1258_v51 = vpop.f32.mrf.mxu0 }
 0x38c   : > { %v1259_v52 = vadd.f32 %v1258_v51, %v1185_v50  ;;  %v1511_v50 = vld [vmem:[%s3663_s6 + $0x98] sm:$0xff]  ;;  %v1510_v51 = vld [vmem:[%s3663_s6 + $0x90] sm:$0xff] }
 0x38d   : > { %v1260_v27 = vpop.f32.mrf.mxu0 }
 0x38e   : > { %v1265_v53 = vand.u32 2147483647, %v1259_v52  ;;  %vm1263_vm5 = vcmp.lt.f32.partialorder %v1259_v52, 0.0  ;;  %v1261_v29 = vadd.f32 %v1260_v27, %v1189_v25  ;;  %v1509_v52 = vld [vmem:[%s3663_s6 + $0x88] sm:$0xff]  ;;  %v1678_v25 = vld [vmem:[%s3690_s5 + $0xd0] sm:$0xff]  ;;  %v1676_v27 = vld [vmem:[%s3690_s5 + $0xc0] sm:$0xff] }
 0x38f   : > { %v1264_v20 = vsel %vm1263_vm5, -1.0, %v3212_v19 }
 0x390   : > { %v1270_v54 = vmax.f32 %v1265_v53, 1e-30  ;;  %v1275_v55 = vadd.f32 1.0, %v1265_v53  ;;  %vm1267_vm1 = vcmp.le.f32.partialorder %v1265_v53, 2.4142137  ;;  %v2304_v0 = vadd.f32 -1.0, %v1265_v53 }
 0x391   : > { %vm1268_vm2 = vcmp.gt.f32.partialorder %v1265_v53, 0.41421357  ;;  %vm1266_vm4 = vcmp.gt.f32.partialorder %v1265_v53, 2.4142137 }
 0x392   : > { %2702 = vrcp.f32 %v1270_v54  ;;  %vm1269_vm3 = vmand %vm1267_vm1, %vm1268_vm2 }
 0x393   : > { %2704 = vrcp.f32 %v1275_v55  ;;  %v1285_v14 = vsel %vm1269_vm3, 0.7853982, %v3210_v4 }
 0x394   : > { %v1286_v17 = vsel %vm1266_vm4, 1.5707964, %v1285_v14 }
 0x39f   : > { %v2703_v56 = vpop.eup %2702 }
 0x3a0   : > { %v2705_v57 = vpop.eup %2704  ;;  %v1272_v58 = vmul.f32 %v2703_v56, %v1270_v54  ;;  %v1507_v54 = vld [vmem:[%s3663_s6 + $0x78] sm:$0xff] }
 0x3a1   : > { %v1277_v59 = vmul.f32 %v2705_v57, %v1275_v55  ;;  %v1506_v55 = vld [vmem:[%s3663_s6 + $0x70] sm:$0xff] }
 0x3a2   : > { %v1273_v60 = vsub.f32 2.0, %v1272_v58  ;;  %v1503_v58 = vld [vmem:[%s3663_s6 + $0x58] sm:$0xff] }
 0x3a3   : > { %v1278_v61 = vsub.f32 2.0, %v1277_v59  ;;  %v1502_v59 = vld [vmem:[%s3663_s6 + $0x50] sm:$0xff] }
 0x3a4   : > { %v1274_v62 = vmul.f32 %v2703_v56, %v1273_v60  ;;  %v1505_v56 = vld [vmem:[%s3663_s6 + $0x68] sm:$0xff] }
 0x3a5   : > { %v1279_v63 = vmul.f32 %v2705_v57, %v1278_v61  ;;  %v1504_v57 = vld [vmem:[%s3663_s6 + $0x60] sm:$0xff]  ;;  %v1501_v60 = vld [vmem:[%s3663_s6 + $0x48] sm:$0xff] }
 0x3a6   : > { %v1280_v1 = vsub.f32 0.0, %v1274_v62  ;;  %v1500_v61 = vld [vmem:[%s3663_s6 + $0x40] sm:$0xff]  ;;  %v1499_v62 = vld [vmem:[%s3663_s6 + $0x38] sm:$0xff] }
 0x3a7   : > { %v1282_v2 = vmul.f32 %v2304_v0, %v1279_v63  ;;  %v1498_v63 = vld [vmem:[%s3663_s6 + $0x30] sm:$0xff]  ;;  %v1497_v0 = vld [vmem:[%s3663_s6 + $0x28] sm:$0xff] }
 0x3a9   : > { %v1283_v3 = vsel %vm1269_vm3, %v1282_v2, %v1265_v53  ;;  %v1508_v53 = vld [vmem:[%s3663_s6 + $0x80] sm:$0xff] }
 0x3aa   : > { %v1284_v5 = vsel %vm1266_vm4, %v1280_v1, %v1283_v3  ;;  %v1496_v1 = vld [vmem:[%s3663_s6 + $0x20] sm:$0xff] }
 0x3ab   : > { %v1287_v6 = vmul.f32 %v1284_v5, %v1284_v5  ;;  %v2307_v2 = vld [vmem:[%s4222_s23] ss:$0 sm:$0xff] }
 0x3ad   : > { %v1288_v7 = vmul.f32 0.080537446, %v1287_v6 }
 0x3af   : > { %v2305_v8 = vadd.f32 -0.13877685, %v1288_v7 }
 0x3b1   : > { %v1290_v9 = vmul.f32 %v2305_v8, %v1287_v6  ;;  %v1495_v8 = vld [vmem:[%s3663_s6 + $0x18] sm:$0xff] }
 0x3b3   : > { %v1291_v10 = vadd.f32 0.19977711, %v1290_v9  ;;  %v1494_v9 = vld [vmem:[%s3663_s6 + $0x10] sm:$0xff] }
 0x3b5   : > { %v1292_v11 = vmul.f32 %v1291_v10, %v1287_v6  ;;  %v1493_v10 = vld [vmem:[%s3663_s6 + $0x8] sm:$0xff] }
 0x3b7   : > { %v2306_v12 = vadd.f32 -0.3333295, %v1292_v11  ;;  %v1492_v11 = vld [vmem:[%s3663_s6] sm:$0xff] }
 0x3b9   : > { %v1294_v13 = vmul.f32 %v2306_v12, %v1287_v6  ;;  %v1683_v12 = vld [vmem:[%s3690_s5 + $0xf8] sm:$0xff] }
 0x3bb   : > { %v1295_v15 = vmul.f32 %v1294_v13, %v1284_v5  ;;  %v2308_v13 = vld [vmem:[%s944_s30] ss:$0 sm:$0xff] }
 0x3bd   : > { %v1296_v16 = vadd.f32 %v1295_v15, %v1284_v5 }
 0x3bf   : > { %v1297_v18 = vadd.f32 %v1296_v16, %v1286_v17 }
 0x3c1   : > { %v1298_v21 = vmul.f32 %v1297_v18, %v1264_v20  ;;  %v1682_v18 = vld [vmem:[%s3690_s5 + $0xf0] sm:$0xff]  ;;  %v1681_v20 = vld [vmem:[%s3690_s5 + $0xe8] sm:$0xff] }
 0x3c3   : > { %v3880_v22 = vmul.f32 1.272, %v1298_v21  ;;  %v1680_v21 = vld [vmem:[%s3690_s5 + $0xe0] sm:$0xff] }
 0x3c5   : > { %v1300_v23 = vmul.f32 1.442695, %v3880_v22 }
 0x3c7   : > { %2706 = vpow2.f32 %v1300_v23  ;;  %v1679_v23 = vld [vmem:[%s3690_s5 + $0xd8] sm:$0xff] }
 0x3d4   : > { %v2707_v28 = vpop.eup %2706 }
 0x3d5   : > { %v1302_v30 = vmul.f32 %v2707_v28, %v958_v26  ;;  %v1677_v26 = vld [vmem:[%s3690_s5 + $0xc8] sm:$0xff]  ;;  %v1675_v28 = vld [vmem:[%s3690_s5 + $0xb8] sm:$0xff] }
 0x3d7   : > { %v3886_v31 = vadd.f32 %v1302_v30, %v1261_v29  ;;  %v1674_v29 = vld [vmem:[%s3690_s5 + $0xb0] sm:$0xff]  ;;  %v1673_v30 = vld [vmem:[%s3690_s5 + $0xa8] sm:$0xff] }
 0x3d9   : > { %2500 = vmatmul.mubr.f32.vlgmr.msra.gmra.mxu1 %v3886_v31 }
 0x3da   : > { %1600 = vmatprep.mubr.f32.mxu1 %v3210_v4  ;;  %1537 = vmatpush1.msra.mxu1 %v1522_v37  ;;  %v1668_v37 = vld [vmem:[%s3690_s5 + $0x80] sm:$0xff] }
 0x3db   : > { %1538 = vmatprep.subr.mxu1 %v1521_v38  ;;  %v1667_v38 = vld [vmem:[%s3690_s5 + $0x78] sm:$0xff] }
 0x3dc   : > { %1539 = vmatpush1.msra.mxu1 %v1520_v39  ;;  %v1666_v39 = vld [vmem:[%s3690_s5 + $0x70] sm:$0xff] }
 0x3dd   : > { %1540 = vmatprep.subr.mxu1 %v1519_v40  ;;  %v1665_v40 = vld [vmem:[%s3690_s5 + $0x68] sm:$0xff] }
 0x3de   : > { %1541 = vmatpush1.msra.mxu1 %v1518_v41  ;;  %v1664_v41 = vld [vmem:[%s3690_s5 + $0x60] sm:$0xff] }
 0x3df   : > { %1542 = vmatprep.subr.mxu1 %v1517_v42  ;;  %v1663_v42 = vld [vmem:[%s3690_s5 + $0x58] sm:$0xff] }
 0x3e0   : > { %1543 = vmatpush1.msra.mxu1 %v1516_v43  ;;  %v1662_v43 = vld [vmem:[%s3690_s5 + $0x50] sm:$0xff] }
 0x3e1   : > { %1544 = vmatprep.subr.mxu1 %v1515_v44  ;;  %v1661_v44 = vld [vmem:[%s3690_s5 + $0x48] sm:$0xff] }
 0x3e2   : > { %1545 = vmatpush1.msra.mxu1 %v1514_v45  ;;  %v1660_v45 = vld [vmem:[%s3690_s5 + $0x40] sm:$0xff] }
 0x3e3   : > { %1546 = vmatprep.subr.mxu1 %v1513_v46  ;;  %v1659_v46 = vld [vmem:[%s3690_s5 + $0x38] sm:$0xff] }
 0x3e4   : > { %1547 = vmatpush1.msra.mxu1 %v1512_v49  ;;  %v1658_v49 = vld [vmem:[%s3690_s5 + $0x30] sm:$0xff] }
 0x3e5   : > { %1548 = vmatprep.subr.mxu1 %v1511_v50  ;;  %v1657_v50 = vld [vmem:[%s3690_s5 + $0x28] sm:$0xff] }
 0x3e6   : > { %1549 = vmatpush1.msra.mxu1 %v1510_v51  ;;  %v1656_v51 = vld [vmem:[%s3690_s5 + $0x20] sm:$0xff] }
 0x3e7   : > { %1550 = vmatprep.subr.mxu1 %v1509_v52  ;;  %v1655_v52 = vld [vmem:[%s3690_s5 + $0x18] sm:$0xff] }
 0x3e8   : > { %1551 = vmatpush1.msra.mxu1 %v1508_v53  ;;  %v1654_v53 = vld [vmem:[%s3690_s5 + $0x10] sm:$0xff] }
 0x3e9   : > { %1552 = vmatprep.subr.mxu1 %v1507_v54  ;;  %v1653_v54 = vld [vmem:[%s3690_s5 + $0x8] sm:$0xff] }
 0x3ea   : > { %1553 = vmatpush1.msra.mxu1 %v1506_v55  ;;  %v1652_v55 = vld [vmem:[%s3690_s5] sm:$0xff] }
 0x3eb   : > { %1554 = vmatprep.subr.mxu1 %v1505_v56  ;;  %v1715_v56 = vld [vmem:[%s3690_s5 + $0x1f8] sm:$0xff] }
 0x3ec   : > { %1555 = vmatpush1.msra.mxu1 %v1504_v57  ;;  %1716 = vmatprep.subr.mxu0 %v1715_v56  ;;  %v1714_v57 = vld [vmem:[%s3690_s5 + $0x1f0] sm:$0xff] }
 0x3ed   : > { %1556 = vmatprep.subr.mxu1 %v1503_v58  ;;  %v1713_v58 = vld [vmem:[%s3690_s5 + $0x1e8] sm:$0xff] }
 0x3ee   : > { %1557 = vmatpush1.msra.mxu1 %v1502_v59  ;;  %v1712_v59 = vld [vmem:[%s3690_s5 + $0x1e0] sm:$0xff] }
 0x3ef   : > { %1558 = vmatprep.subr.mxu1 %v1501_v60  ;;  %v1711_v60 = vld [vmem:[%s3690_s5 + $0x1d8] sm:$0xff] }
 0x3f0   : > { %1559 = vmatpush1.msra.mxu1 %v1500_v61  ;;  %v1710_v61 = vld [vmem:[%s3690_s5 + $0x1d0] sm:$0xff] }
 0x3f1   : > { %1560 = vmatprep.subr.mxu1 %v1499_v62  ;;  %v1709_v62 = vld [vmem:[%s3690_s5 + $0x1c8] sm:$0xff] }
 0x3f2   : > { %1561 = vmatpush1.msra.mxu1 %v1498_v63  ;;  %v1707_v63 = vld [vmem:[%s3690_s5 + $0x1b8] sm:$0xff] }
 0x3f3   : > { %1562 = vmatprep.subr.mxu1 %v1497_v0  ;;  %v1706_v0 = vld [vmem:[%s3690_s5 + $0x1b0] sm:$0xff] }
 0x3f4   : > { %1563 = vmatpush1.msra.mxu1 %v1496_v1  ;;  %v1705_v1 = vld [vmem:[%s3690_s5 + $0x1a8] sm:$0xff] }
 0x3f5   : > { %1564 = vmatprep.subr.mxu1 %v1495_v8  ;;  %v1699_v8 = vld [vmem:[%s3690_s5 + $0x178] sm:$0xff] }
 0x3f6   : > { %1565 = vmatpush1.msra.mxu1 %v1494_v9  ;;  %v1698_v9 = vld [vmem:[%s3690_s5 + $0x170] sm:$0xff] }
 0x3f7   : > { %1566 = vmatprep.subr.mxu1 %v1493_v10  ;;  %v1697_v10 = vld [vmem:[%s3690_s5 + $0x168] sm:$0xff] }
 0x3f8   : > { %1567 = vmatpush1.msra.mxu1 %v1492_v11  ;;  %v1696_v11 = vld [vmem:[%s3690_s5 + $0x160] sm:$0xff] }
 0x3f9   : > { %1787 = vmatprep.subr.mxu1 %v1683_v12  ;;  %v1695_v12 = vld [vmem:[%s3690_s5 + $0x158] sm:$0xff] }
 0x499   : > { %v1393_v3 = vpop.f32.mrf.mxu1 }
 0x49a   : > { %v1394_v5 = vadd.f32 %v2307_v2, %v1393_v3  ;;  %v1704_v2 = vld [vmem:[%s3690_s5 + $0x1a0] sm:$0xff]  ;;  %v1703_v3 = vld [vmem:[%s3690_s5 + $0x198] sm:$0xff] }
 0x49b   : > { %v2501_v6 = vpop.f32.mrf.mxu1 }
 0x49c   : > { %v1397_v7 = vmax.f32 %v1394_v5, 0.0  ;;  %v1702_v5 = vld [vmem:[%s3690_s5 + $0x190] sm:$0xff]  ;;  %v1701_v6 = vld [vmem:[%s3690_s5 + $0x188] sm:$0xff] }
 0x49e   : > { %2535 = vmatmul.mubr.f32.vlgmr.msra.gmra.mxu0 %v1397_v7  ;;  %v1700_v7 = vld [vmem:[%s3690_s5 + $0x180] sm:$0xff] }
 0x49f   : > { %1780 = vmatprep.mubr.f32.mxu0 %v3210_v4  ;;  %1717 = vmatpush1.msra.mxu0 %v1714_v57 }
 0x4a0   : > { %1718 = vmatprep.subr.mxu0 %v1713_v58 }
 0x4a1   : > { %1719 = vmatpush1.msra.mxu0 %v1712_v59 }
 0x4a2   : > { %1720 = vmatprep.subr.mxu0 %v1711_v60 }
 0x4a3   : > { %1721 = vmatpush1.msra.mxu0 %v1710_v61 }
 0x4a4   : > { %1722 = vmatprep.subr.mxu0 %v1709_v62 }
 0x55e   : > { %v1487_v14 = vpop.f32.mrf.mxu0 }
 0x55f   : > { %v1488_v15 = vadd.f32 %v2308_v13, %v1487_v14  ;;  %v1694_v13 = vld [vmem:[%s3690_s5 + $0x150] sm:$0xff]  ;;  %v1693_v14 = vld [vmem:[%s3690_s5 + $0x148] sm:$0xff] }
 0x560   : > { %v2536_v16 = vpop.f32.mrf.mxu0 }
 0x561   : > { %v1491_v17 = vmax.f32 %v1488_v15, 0.0  ;;  %v1692_v15 = vld [vmem:[%s3690_s5 + $0x140] sm:$0xff]  ;;  %v1691_v16 = vld [vmem:[%s3690_s5 + $0x138] sm:$0xff] }
 0x563   : > { %1601 = vmatmul.mubr.f32.vlgmr.msra.gmra.mxu1 %v1491_v17  ;;  %v1690_v17 = vld [vmem:[%s3690_s5 + $0x130] sm:$0xff] }
 0x564   : > { %1788 = vmatpush1.msra.mxu1 %v1682_v18  ;;  %1851 = vmatprep.mubr.f32.mxu1 %v3210_v4  ;;  %v1689_v18 = vld [vmem:[%s3690_s5 + $0x128] sm:$0xff] }
 0x565   : > { %1789 = vmatprep.subr.mxu1 %v1681_v20  ;;  %v1688_v20 = vld [vmem:[%s3690_s5 + $0x120] sm:$0xff] }
 0x566   : > { %1790 = vmatpush1.msra.mxu1 %v1680_v21  ;;  %v1687_v21 = vld [vmem:[%s3690_s5 + $0x118] sm:$0xff] }
 0x567   : > { %1791 = vmatprep.subr.mxu1 %v1679_v23  ;;  %v1686_v23 = vld [vmem:[%s3690_s5 + $0x110] sm:$0xff] }
 0x568   : > { %1792 = vmatpush1.msra.mxu1 %v1678_v25  ;;  %v1685_v25 = vld [vmem:[%s3690_s5 + $0x108] sm:$0xff] }
 0x569   : > { %1793 = vmatprep.subr.mxu1 %v1677_v26  ;;  %v1684_v26 = vld [vmem:[%s3690_s5 + $0x100] sm:$0xff] }
 0x56a   : > { %1794 = vmatpush1.msra.mxu1 %v1676_v27  ;;  %v1524_v27 = vld [vmem:[%s3688_s1] sm:$0x3] }
 0x56b   : > { %1795 = vmatprep.subr.mxu1 %v1675_v28  ;;  %v1529_v28 = vrot.slane %v1524_v27, %v1184_v48 }
 0x56c   : > { %1796 = vmatpush1.msra.mxu1 %v1674_v29 }
 0x56d   : > { %1797 = vmatprep.subr.mxu1 %v1673_v30 }
 0x56e   : > { %1798 = vmatpush1.msra.mxu1 %v1672_v32 }
 0x56f   : > { %1799 = vmatprep.subr.mxu1 %v1671_v34 }
 0x570   : > { %1800 = vmatpush1.msra.mxu1 %v1670_v35 }
 0x571   : > { %1801 = vmatprep.subr.mxu1 %v1669_v36 }
 0x572   : > { %1802 = vmatpush1.msra.mxu1 %v1668_v37 }
 0x573   : > { %1803 = vmatprep.subr.mxu1 %v1667_v38 }
 0x574   : > { %1804 = vmatpush1.msra.mxu1 %v1666_v39 }
 0x575   : > { %1805 = vmatprep.subr.mxu1 %v1665_v40 }
 0x576   : > { %1806 = vmatpush1.msra.mxu1 %v1664_v41 }
 0x577   : > { %1807 = vmatprep.subr.mxu1 %v1663_v42 }
 0x578   : > { %1808 = vmatpush1.msra.mxu1 %v1662_v43 }
 0x579   : > { %1809 = vmatprep.subr.mxu1 %v1661_v44 }
 0x57a   : > { %1810 = vmatpush1.msra.mxu1 %v1660_v45 }
 0x57b   : > { %1811 = vmatprep.subr.mxu1 %v1659_v46 }
 0x57c   : > { %1812 = vmatpush1.msra.mxu1 %v1658_v49 }
 0x57d   : > { %1813 = vmatprep.subr.mxu1 %v1657_v50 }
 0x57e   : > { %1814 = vmatpush1.msra.mxu1 %v1656_v51 }
 0x57f   : > { %1815 = vmatprep.subr.mxu1 %v1655_v52 }
 0x580   : > { %1816 = vmatpush1.msra.mxu1 %v1654_v53 }
 0x581   : > { %1817 = vmatprep.subr.mxu1 %v1653_v54 }
 0x582   : > { %1818 = vmatpush1.msra.mxu1 %v1652_v55 }
 0x583   : > { %1852 = vmatmul.mubr.f32.vlgmr.msra.gmra.mxu1 %v3886_v31  ;;  %v1708_v31 = vld [vmem:[%s3690_s5 + $0x1c0] sm:$0xff]  ;;  %s4224_s5 = sld [smem:[#allocation39_spill]] }
 0x584   : > { %1723 = vmatpush1.msra.mxu0 %v1708_v31 }
 0x585   : > { %1724 = vmatprep.subr.mxu0 %v1707_v63 }
 0x586   : > { %1725 = vmatpush1.msra.mxu0 %v1706_v0 }
 0x587   : > { %1726 = vmatprep.subr.mxu0 %v1705_v1  ;;  %v1648_v1 = vld [vmem:[#allocation3] sm:$0xff] }
 0x588   : > { %1727 = vmatpush1.msra.mxu0 %v1704_v2 }
 0x589   : > { %1728 = vmatprep.subr.mxu0 %v1703_v3  ;;  %p2312_p8 = scmp.ne.s32.totalorder %s4224_s5, 2 }
 0x58a   : > { %1729 = vmatpush1.msra.mxu0 %v1702_v5 }
 0x58b   : > { %1730 = vmatprep.subr.mxu0 %v1701_v6  ;;  %v1533_v6 = vrot.slane %v1524_v27, %v1188_v24 }
 0x58c   : > { %1731 = vmatpush1.msra.mxu0 %v1700_v7 }
 0x58d   : > { %1732 = vmatprep.subr.mxu0 %v1699_v8 }
 0x58e   : > { %1733 = vmatpush1.msra.mxu0 %v1698_v9 }
 0x58f   : > { %1734 = vmatprep.subr.mxu0 %v1697_v10 }
 0x590   : > { %1735 = vmatpush1.msra.mxu0 %v1696_v11 }
 0x591   : > { %1736 = vmatprep.subr.mxu0 %v1695_v12 }
 0x592   : > { %1737 = vmatpush1.msra.mxu0 %v1694_v13 }
 0x593   : > { %1738 = vmatprep.subr.mxu0 %v1693_v14 }
 0x594   : > { %1739 = vmatpush1.msra.mxu0 %v1692_v15 }
 0x595   : > { %1740 = vmatprep.subr.mxu0 %v1691_v16 }
 0x596   : > { %1741 = vmatpush1.msra.mxu0 %v1690_v17 }
 0x597   : > { %1742 = vmatprep.subr.mxu0 %v1689_v18 }
 0x598   : > { %1743 = vmatpush1.msra.mxu0 %v1688_v20 }
 0x599   : > { %1744 = vmatprep.subr.mxu0 %v1687_v21 }
 0x59a   : > { %1745 = vmatpush1.msra.mxu0 %v1686_v23 }
 0x59b   : > { %1746 = vmatprep.subr.mxu0 %v1685_v25 }
 0x59c   : > { %1747 = vmatpush1.msra.mxu0 %v1684_v26 }
 0x623   : > { %v1602_v29 = vpop.f32.mrf.mxu1 }
 0x624   : > { %v1603_v30 = vadd.f32 %v1602_v29, %v1529_v28 }
 0x626   : > { %v1609_v32 = vand.u32 2147483647, %v1603_v30  ;;  %vm1607_vm10 = vcmp.lt.f32.partialorder %v1603_v30, 0.0 }
 0x627   : > { %v1608_v31 = vsel %vm1607_vm10, -1.0, %v3212_v19 }
 0x628   : > { %v1614_v34 = vmax.f32 %v1609_v32, 1e-30  ;;  %v1619_v35 = vadd.f32 1.0, %v1609_v32  ;;  %vm1611_vm6 = vcmp.le.f32.partialorder %v1609_v32, 2.4142137  ;;  %v2309_v44 = vadd.f32 -1.0, %v1609_v32 }
 0x629   : > { %vm1612_vm7 = vcmp.gt.f32.partialorder %v1609_v32, 0.41421357  ;;  %vm1610_vm9 = vcmp.gt.f32.partialorder %v1609_v32, 2.4142137 }
 0x62a   : > { %2708 = vrcp.f32 %v1614_v34  ;;  %vm1613_vm8 = vmand %vm1611_vm6, %vm1612_vm7 }
 0x62b   : > { %2710 = vrcp.f32 %v1619_v35  ;;  %v1629_v58 = vsel %vm1613_vm8, 0.7853982, %v3210_v4  ;;  %v1604_v4 = vpop.f32.mrf.mxu1 }
 0x62c   : > { %v1630_v61 = vsel %vm1610_vm9, 1.5707964, %v1629_v58  ;;  %v1605_v8 = vadd.f32 %v1604_v4, %v1533_v6 }
 0x637   : > { %v2709_v36 = vpop.eup %2708 }
 0x638   : > { %v2711_v37 = vpop.eup %2710  ;;  %v1616_v38 = vmul.f32 %v2709_v36, %v1614_v34 }
 0x639   : > { %v1621_v39 = vmul.f32 %v2711_v37, %v1619_v35 }
 0x63a   : > { %v1617_v40 = vsub.f32 2.0, %v1616_v38 }
 0x63b   : > { %v1622_v41 = vsub.f32 2.0, %v1621_v39 }
 0x63c   : > { %v1618_v42 = vmul.f32 %v2709_v36, %v1617_v40 }
 0x63d   : > { %v1623_v43 = vmul.f32 %v2711_v37, %v1622_v41 }
 0x63e   : > { %v1624_v45 = vsub.f32 0.0, %v1618_v42 }
 0x63f   : > { %v1626_v48 = vmul.f32 %v2309_v44, %v1623_v43 }
 0x641   : > { %v1627_v46 = vsel %vm1613_vm8, %v1626_v48, %v1609_v32 }
 0x642   : > { %v1628_v49 = vsel %vm1610_vm9, %v1624_v45, %v1627_v46 }
 0x643   : > { %v1631_v50 = vmul.f32 %v1628_v49, %v1628_v49  ;;  %v1853_v19 = vpop.f32.mrf.mxu1 }
 0x645   : > { %v1632_v51 = vmul.f32 0.080537446, %v1631_v50  ;;  %v1855_v13 = vpop.f32.mrf.mxu1 }
 0x647   : > { %v2310_v52 = vadd.f32 -0.13877685, %v1632_v51 }
 0x649   : > { %v1634_v53 = vmul.f32 %v2310_v52, %v1631_v50 }
 0x64b   : > { %v1635_v54 = vadd.f32 0.19977711, %v1634_v53 }
 0x64d   : > { %v1636_v55 = vmul.f32 %v1635_v54, %v1631_v50 }
 0x64f   : > { %v2311_v56 = vadd.f32 -0.3333295, %v1636_v55 }
 0x651   : > { %v1638_v57 = vmul.f32 %v2311_v56, %v1631_v50 }
 0x653   : > { %v1639_v59 = vmul.f32 %v1638_v57, %v1628_v49 }
 0x655   : > { %v1640_v60 = vadd.f32 %v1639_v59, %v1628_v49 }
 0x657   : > { %v1641_v62 = vadd.f32 %v1640_v60, %v1630_v61 }
 0x659   : > { %v1642_v63 = vmul.f32 %v1641_v62, %v1608_v31 }
 0x65b   : > { %v1643_v0 = vmul.f32 1.272, %v1642_v63 }
 0x65d   : > { %v1644_v2 = vmul.f32 1.442695, %v1643_v0  ;;  %v1649_v3 = vadd.f32 %v1643_v0, %v3880_v22 }
 0x65f   : > { %2712 = vpow2.f32 %v1644_v2  ;;  %v1650_v5 = vadd.f32 %v1649_v3, %v1648_v1 }
 0x661   : > { %1651 = vst [vmem:[#allocation3] sm:$0xff] %v1650_v5 }
 0x66c   : > { %v2713_v7 = vpop.eup %2712 }
 0x66d   : > { %v1646_v9 = vmul.f32 %v2713_v7, %v3762_v33 }
 0x66f   : > { %v1647_v10 = vadd.f32 %v1646_v9, %v1605_v8 }
 0x671   : > { %1781 = vmatmul.mubr.f32.vlgmr.msra.gmra.mxu0 %v1647_v10 }
 0x731   : > { %v1782_v11 = vpop.f32.mrf.mxu0 }
 0x732   : > { %v1854_v12 = vadd.f32 %v1853_v19, %v1782_v11  ;;  %1863 = sbr.rel (%p2312_p8) target bundleno = 1987 (0x7c3), region = 128 }
 0x733   : > { %v1784_v14 = vpop.f32.mrf.mxu0 }
 0x734   : > { %1858 = vst [vmem:[#allocation2] sm:$0xff] %v1854_v12  ;;  %v1856_v22 = vadd.f32 %v1855_v13, %v1784_v14 }
 0x736   : > { %1859 = vst [vmem:[#allocation2 + $0x8] sm:$0xff] %v1856_v22 }
 0x737   : > { %v1868_v15 = vld [vmem:[#allocation3] sm:$0xff] }
 0x738   : > { %1869 = vadd.xlane.f32.xlu0 %v1868_v15 }
 0x73b   : > { %v1864_v47 = vld [vmem:[#allocation2] sm:$0xff] }
 0x73c   : > { %1866 = vst [vmem:[%s3694_s22] sm:$0xff] %v1864_v47 }
 0x73d   : > { %v1865_v24 = vld [vmem:[#allocation2 + $0x8] sm:$0xff] }
 0x73e   : > { %1867 = vst [vmem:[%s3694_s22 + $0x8] sm:$0xff] %v1865_v24 }
 0x7c1   : > { %v1870_v33 = vpop.xlane.xlu0 %1869 }
 0x7c2   : > { %1871 = vst [vmem:[%s3696_s28] sm:$0xff] %v1870_v33 }
 0x7c3 PF: > { %s4225_s1 = sld [smem:[#allocation40_spill]]  ;;  %s1892_s27 = sshll.u32 %s3694_s22, 4  ;;  %s1893_s27 = int_to_ptr.vmem [resolvable:$true] %s1892_s27 }
 0x7c4   : > { %s4226_s12 = sld [smem:[#allocation64_spill]]  ;;  %s1873_s11 = scalar_lea.sflag [#allocation6], %s3616_s4 }
 0x7c5   : > { %s3022_s13 = scalar_lea.vmem %s1893_s27, 256  ;;  %s3213_s19 = smov [#allocation22]  }
 0x7c6   : > { %p3023_p13 = scmp.ne.s32.totalorder %s1893_s27, %s3022_s13  ;;  %s3026_s29 = sshll.u32 %s3213_s19, 4  ;;  %s3027_s29 = int_to_ptr.vmem [resolvable:$false] %s3026_s29 }
 0x7c7   : > { %s3028_s9 = scalar_lea.vmem %s3027_s29, 512  ;;  %p3029_p7 = scmp.lt.s32.totalorder %s1893_s27, %s3027_s29 }
 0x7c8   : > { %p3024_p0 = pnand %p3023_p13, %p3521_p9  ;;  %p3030_p10 = scmp.lt.s32.totalorder %s3028_s9, %s3022_s13 }
 0x7c9   : > { %s2328_s14 = sshll.u32 %s4225_s1, 8 }
 0x7ca   : > { %s1890_s6 = scalar_lea.hbm %s4226_s12, %s2328_s14  ;;  %p3025_p6 = pneg %p3024_p0 }
 0x7cb   : > { %p3031_p1 = por %p3030_p10, %p3029_p7 }
 0x7cd   : > { %p3032_p12 = pnand %p3031_p1, %p3025_p6 }
 0x7cf   : > { %3035 = shalt.err (!%p3032_p12)
}
 0x7d0   : > { %s3036_s2 = scalar_lea.hbm %s1890_s6, 256  ;;  %s3040_s30 = scalar_lea.hbm %s4226_s12, 512 }
 0x7d1   : > { %p3037_p5 = scmp.ne.s32.totalorder %s1890_s6, %s3036_s2  ;;  %p3041_p2 = scmp.lt.s32.totalorder %s1890_s6, %s4226_s12 }
 0x7d2   : > { %p3042_p8 = scmp.lt.s32.totalorder %s3040_s30, %s3036_s2 }
 0x7d3   : > { %p3038_p11 = pnand %p3037_p5, %p3521_p9 }
 0x7d4   : > { %p3043_p13 = por %p3042_p8, %p3041_p2 }
 0x7d5   : > { %p3039_p4 = pneg %p3038_p11 }
 0x7d7   : > { %p3044_p0 = pnand %p3043_p13, %p3039_p4 }
 0x7d9   : > { %3047 = shalt.err (!%p3044_p0)
}
 0x7da   : > { %2559 = dma.vmem_to_hbm [thread:$0]  (%p3521_p9), %s1893_s27, 256, %s1890_s6, %s1873_s11  }
 0x7db   : > { %s2317_s8 = sshll.u32 %s4225_s1, 7  ;;  %s1905_s15 = sshll.u32 %s3696_s28, 4  ;;  %s1906_s15 = int_to_ptr.vmem [resolvable:$true] %s1905_s15 }
 0x7dc   : > { %s4227_s10 = sld [smem:[#allocation65_spill]]  ;;  %s1878_s7 = scalar_lea.sflag [#allocation24], %s3616_s4 }
 0x7dd   : > { %s3048_s17 = scalar_lea.vmem %s1906_s15, 128  ;;  %s3214_s25 = smov [#allocation23]  }
 0x7de   : > { %p3049_p6 = scmp.ne.s32.totalorder %s1906_s15, %s3048_s17  ;;  %s3052_s5 = sshll.u32 %s3214_s25, 4  ;;  %s3053_s5 = int_to_ptr.vmem [resolvable:$false] %s3052_s5 }
 0x7df   : > { %s3054_s14 = scalar_lea.vmem %s3053_s5, 256  ;;  %p3055_p1 = scmp.lt.s32.totalorder %s1906_s15, %s3053_s5 }
 0x7e0   : > { %p3050_p7 = pnand %p3049_p6, %p3521_p9  ;;  %p3056_p12 = scmp.lt.s32.totalorder %s3054_s14, %s3048_s17 }
 0x7e2   : > { %s1903_s23 = scalar_lea.hbm %s4227_s10, %s2317_s8  ;;  %p3051_p10 = pneg %p3050_p7 }
 0x7e3   : > { %p3057_p5 = por %p3056_p12, %p3055_p1 }
 0x7e5   : > { %p3058_p11 = pnand %p3057_p5, %p3051_p10 }
 0x7e7   : > { %3061 = shalt.err (!%p3058_p11)
}
 0x7e8   : > { %s3062_s28 = scalar_lea.hbm %s1903_s23, 128  ;;  %s3066_s16 = scalar_lea.hbm %s4227_s10, 256 }
 0x7e9   : > { %p3063_p4 = scmp.ne.s32.totalorder %s1903_s23, %s3062_s28  ;;  %p3067_p13 = scmp.lt.s32.totalorder %s1903_s23, %s4227_s10 }
 0x7ea   : > { %p3068_p0 = scmp.lt.s32.totalorder %s3066_s16, %s3062_s28 }
 0x7eb   : > { %p3064_p2 = pnand %p3063_p4, %p3521_p9 }
 0x7ec   : > { %p3069_p6 = por %p3068_p0, %p3067_p13 }
 0x7ed   : > { %p3065_p8 = pneg %p3064_p2 }
 0x7ef   : > { %p3070_p7 = pnand %p3069_p6, %p3065_p8 }
 0x7f1   : > { %3073 = shalt.err (!%p3070_p7)
}
 0x7f2   : > { %2560 = dma.vmem_to_hbm [thread:$0]  (%p3521_p9), %s1906_s15, 128, %s1903_s23, %s1878_s7  }
 0x7f3 PF: > { %s4228_s27 = sld [smem:[#allocation43_spill]] }
 0x7f4   : > { %s4229_s11 = sld [smem:[#allocation36_spill]] }
 0x7f9   : > { %p2605_p10 = scmp.ge.s32.totalorder %s4228_s27, 2 }
 0x7fa   : > { %s1917_s19 = sand.u32 1, %s4229_s11  }
 0x7fb   : > { %p2598_p1 = pnand %p2605_p10, %p3530_p3  ;;  %s1918_s29 = scalar_lea.sflag [#allocation6], %s1917_s19 }
 0x7fd   : > { %p2599_p12 = pneg %p2598_p1 }
 0x7ff   : > { %3143 = dma.done.wait (%p2599_p12), %s1918_s29, 256  }
 0x800   : > { %3145 = vsyncadd (%p2599_p12), %s1918_s29, 4294967040  ;;  %s1927_s9 = scalar_lea.sflag [#allocation24], %s1917_s19 }
 0x801   : > { %3147 = dma.done.wait (%p2599_p12), %s1927_s9, 128  }
 0x802   : > { %3149 = vsyncadd (%p2599_p12), %s1927_s9, 4294967168  ;;  %s50_s28 = sadd.s32 1, %s4228_s27   ;;  %s4231_s18 = sld [smem:[#allocation34_spill]] }
 0x803   : > { %p47_p5 = scmp.ge.s32.totalorder %s50_s28, 8   ;;  %s4232_s19 = sld [smem:[#allocation35_spill]] }
 0x804   : > { %s4233_s20 = sld [smem:[#allocation48_spill]] }
 0x805   : > { %s4234_s21 = sld [smem:[#allocation37_spill]] }
 0x806   : > { %s4235_s22 = sld [smem:[#allocation38_spill]] }
 0x807   : > { %s4236_s23 = sld [smem:[#allocation49_spill]]  ;;  %49 = sbr.rel (!%p47_p5) target bundleno = 38 (0x26), region = 275 }
 0x808   : > { %s4237_s24 = sld [smem:[#allocation41_spill]] }
 0x809   : > { %s4238_s25 = sld [smem:[#allocation42_spill]] }
 0x80a   : > { %s4239_s26 = sld [smem:[#allocation46_spill]] }
 0x80b   : > { %s4240_s27 = sld [smem:[#allocation47_spill]] }
 0x80c   :  { %1932 = vsyncpa [#allocation5], 1 }
 0x80d   :  { %1934 = vsyncpa [#allocation5 + $0x1], 1 }
 0x80e   :  { %1935 = vsyncpa [#allocation8], 1 }
 0x80f   :  { %1937 = vsyncpa [#allocation8 + $0x1], 1 }
 0x810   :  { %1938 = vsyncpa [#allocation11], 1 }
 0x811   :  { %1940 = vsyncpa [#allocation11 + $0x1], 1 }
 0x812   :  { %1941 = vsyncpa [#allocation14], 1 }
 0x813   :  { %1943 = vsyncpa [#allocation14 + $0x1], 1 }
 0x814   :  { %1944 = vsyncpa [#allocation17], 1 }
 0x815   :  { %1946 = vsyncpa [#allocation17 + $0x1], 1 }
 0x816   :  { %1947 = vsyncpa [#allocation20], 1 }
 0x817   :  { %1949 = vsyncpa [#allocation20 + $0x1], 1 }
 0x818   :  { %1950 = vsyncpa [#allocation6], 1 }
 0x819   :  { %1952 = vsyncpa [#allocation6 + $0x1], 1 }
 0x81a   :  { %1953 = vsyncpa [#allocation24], 1 }
 0x81b   :  { %1955 = vsyncpa [#allocation24 + $0x1], 1 }

</bundles_post_ra>
